<compile_context>
chip_gen: v7x
topology: tpu7x:2x2x1
jax: 0.10.0
libtpu: 0.0.40
codegen_flags: <defaults>
</compile_context>

<pallas_src>
import functools

import jax
import jax.numpy as jnp
from jax.experimental import pallas as pl
from jax.experimental.pallas import tpu as pltpu

EPS = 1e-5
C_IN = 256     # FPN output channels (last_conv input)
C_MID = 128    # last_conv output channels
C_HID = 256    # classifier hidden width
N_CLS = 10
OUT_PAD = 16   # classifier output rows padded to a multiple of 8


def _fused_head_classifier_kernel(x_ref, wc_ref, sh2_ref, w1_ref, sh1_ref,
                                  w2_ref, b2_ref, out_ref, acc_ref, *, hw, pad):
    # x_ref:   (1, 256, T) bf16   NCHW-native spatial tile of one batch element
    # wc_ref:  (128, 256)  bf16   1x1 conv weight with BN2d scale folded in
    # sh2_ref: (128, 1)    f32    BN2d shift
    # w1_ref:  (256, 128)  f32    Linear1 weight with BN1d scale folded in
    # sh1_ref: (256, 1)    f32    BN1d shift
    # w2_ref:  (16, 256)   f32    Linear2 weight, zero-padded rows 10..15
    # b2_ref:  (16, 1)     f32    Linear2 bias, zero-padded
    # out_ref: (1, 16, 1)  f32    sigmoid(logits) for this batch element
    # acc_ref: (128, 1)    f32    per-channel running post-ReLU sums
    k = pl.program_id(1)

    @pl.when(k == 0)
    def _init():
        acc_ref[...] = jnp.zeros_like(acc_ref)

    # 1x1 conv as W(128,256) @ x(256,T) on the MXU, BN2d shift + ReLU on the VPU,
    # then a lane-reduce (XLU slot) so only a (128,1) column is accumulated.
    y = jnp.dot(wc_ref[...], x_ref[0], preferred_element_type=jnp.float32)   # (128, T)
    y = jnp.maximum(y + sh2_ref[...], 0.0)
    acc_ref[...] += jnp.sum(y, axis=1, keepdims=True)                        # (128, 1)

    @pl.when(k == pl.num_programs(1) - 1)
    def _finalize():
        s = acc_ref[...]
        if pad > 0:
            # Zero-padded spatial columns each contributed ReLU(sh2); remove them once.
            s = s - float(pad) * jnp.maximum(sh2_ref[...], 0.0)
        feat = s * (1.0 / float(hw))                                         # (128, 1) pooled
        # classifier (column form): Linear + BN1d(folded) + ReLU + Dropout(id) + Linear + Sigmoid
        h = jnp.dot(w1_ref[...], feat, preferred_element_type=jnp.float32)
        h = jnp.maximum(h + sh1_ref[...], 0.0)                               # (256, 1)
        logits = jnp.dot(w2_ref[...], h, preferred_element_type=jnp.float32) + b2_ref[...]
        out_ref[0] = jax.nn.sigmoid(logits)                                  # (16, 1)


def _pick_tile(hw, cap):
    """Largest 128-multiple tile <= cap that divides HW, preferring n_tiles >= 2."""
    cap = max(128, (cap // 128) * 128)
    if hw >= 256:
        cap = min(cap, 128 * (hw // 256))     # keep >= 2 tiles so DMA pipelines with compute
    for t in range(cap, 127, -128):           # exact divisor -> no padding copy needed
        if hw % t == 0:
            return t
    if hw <= cap:
        return 128 * (-(-hw // 128))          # single (padded) tile
    return cap                                # padded multi-tile; scalar correction in-kernel


def model_forward(x_nchw, params, *, hw_tile=512):
    """Fused last_conv + classifier. x_nchw: (B, 256, H, W) FPN output (NCHW)."""
    wc, sh2, w1f, sh1, w2p, b2p = params
    B, C, H, W = x_nchw.shape
    assert C == C_IN
    HW = H * W
    T = _pick_tile(HW, hw_tile)
    n_tiles = -(-HW // T)
    HWp = n_tiles * T

    # Free reshape (no transpose / no extra HBM pass). In the full model the FPN producer
    # emits bf16 directly; cast only if the caller handed us f32.
    x = x_nchw.reshape(B, C, HW)
    if x.dtype != jnp.bfloat16:
        x = x.astype(jnp.bfloat16)
    if HWp != HW:
        # Only taken when HW has no 128-multiple divisor <= cap; correction handles the tail.
        x = jnp.pad(x, ((0, 0), (0, 0), (0, HWp - HW)))

    kernel = functools.partial(_fused_head_classifier_kernel, hw=HW, pad=HWp - HW)

    out = pl.pallas_call(
        kernel,
        out_shape=jax.ShapeDtypeStruct((B, OUT_PAD, 1), jnp.float32),
        grid_spec=pltpu.PrefetchScalarGridSpec(
            num_scalar_prefetch=0,
            grid=(B, n_tiles),                                 # (parallel batch, HW reduction)
            in_specs=[
                pl.BlockSpec((1, C_IN, T), lambda b, k: (b, 0, k)),
                pl.BlockSpec((C_MID, C_IN), lambda b, k: (0, 0)),
                pl.BlockSpec((C_MID, 1), lambda b, k: (0, 0)),
                pl.BlockSpec((C_HID, C_MID), lambda b, k: (0, 0)),
                pl.BlockSpec((C_HID, 1), lambda b, k: (0, 0)),
                pl.BlockSpec((OUT_PAD, C_HID), lambda b, k: (0, 0)),
                pl.BlockSpec((OUT_PAD, 1), lambda b, k: (0, 0)),
            ],
            out_specs=pl.BlockSpec((1, OUT_PAD, 1), lambda b, k: (b, 0, 0)),
            scratch_shapes=[
                pltpu.VMEM((C_MID, 1), jnp.float32),           # per-channel running sums
            ],
        ),
        compiler_params=pltpu.CompilerParams(
            dimension_semantics=("parallel", "arbitrary"),
            vmem_limit_bytes=64 * 1024 * 1024,
        ),
    )(x, wc, sh2, w1f, sh1, w2p, b2p)

    return out[:, :N_CLS, 0]   # (B, 10)


def make_params(key):
    """Deterministic params matching the PyTorch shapes/inits, with BN scales pre-folded."""
    k_conv, k_w1, k_w2, k_b2 = jax.random.split(key, 4)

    # Conv2d(256,128,1,bias=False): kaiming_normal_, fan_in=256 -> std=sqrt(2/256); (out,in)
    conv_w = jax.random.normal(k_conv, (C_MID, C_IN), jnp.float32) * jnp.sqrt(2.0 / C_IN)
    # BatchNorm2d(128), eval stats at init: gamma=1, beta=0, mean=0, var=1
    s2 = jnp.ones((C_MID,)) * jax.lax.rsqrt(jnp.ones((C_MID,)) + EPS)
    wc = (conv_w * s2[:, None]).astype(jnp.bfloat16)            # fold BN2d scale into conv
    sh2 = jnp.zeros((C_MID, 1), jnp.float32)                    # beta - mean*scale

    # Linear(128,256,bias=False): U(+-1/sqrt(128)); PyTorch weight is (out,in)
    lim1 = 1.0 / jnp.sqrt(float(C_MID))
    w1 = jax.random.uniform(k_w1, (C_HID, C_MID), jnp.float32, -lim1, lim1)
    s1 = jnp.ones((C_HID,)) * jax.lax.rsqrt(jnp.ones((C_HID,)) + EPS)
    w1f = w1 * s1[:, None]                                      # fold BN1d scale into rows
    sh1 = jnp.zeros((C_HID, 1), jnp.float32)

    # Linear(256,10): U(+-1/sqrt(256)) for weight and bias; zero-pad to 16 output rows
    lim2 = 1.0 / jnp.sqrt(float(C_HID))
    w2 = jax.random.uniform(k_w2, (N_CLS, C_HID), jnp.float32, -lim2, lim2)
    b2 = jax.random.uniform(k_b2, (N_CLS,), jnp.float32, -lim2, lim2)
    w2p = jnp.zeros((OUT_PAD, C_HID), jnp.float32).at[:N_CLS].set(w2)
    b2p = jnp.zeros((OUT_PAD, 1), jnp.float32).at[:N_CLS, 0].set(b2)

    return wc, sh2, w1f, sh1, w2p, b2p


if __name__ == "__main__":
    key = jax.random.PRNGKey(0)
    k_x, k_p = jax.random.split(key)

    # FPN output feature map stand-in: [B=2, C=256, H=16, W=16].
    B, H, W = 2, 16, 16
    x_f32 = jax.random.normal(k_x, (B, C_IN, H, W), jnp.float32)
    # Stand-in for the FPN producer emitting bf16 (avoids an extra HBM cast pass).
    x = x_f32.astype(jnp.bfloat16)
    params = make_params(k_p)

    # HW=256 -> T=128, 2 spatial tiles: exercises the reduction-axis accumulator path.
    out = model_forward(x, params)
    out = jax.block_until_ready(out)

    # Plain-JAX reference using the same folded / bf16 parameters.
    wc, sh2, w1f, sh1, w2p, b2p = params
    HW = H * W
    xr = jnp.transpose(x, (0, 2, 3, 1)).reshape(B, HW, C_IN)
    y = jnp.einsum("bpc,oc->bpo", xr, wc, preferred_element_type=jnp.float32)
    y = jnp.maximum(y + sh2.reshape(1, 1, C_MID), 0.0)
    feat = jnp.mean(y, axis=1)                                         # (B, 128)
    h = jnp.maximum(feat @ w1f.T + sh1.reshape(1, C_HID), 0.0)
    ref = jax.nn.sigmoid(h @ w2p.T + b2p.reshape(1, OUT_PAD))[:, :N_CLS]

    assert out.shape == (B, N_CLS), out.shape
    err = float(jnp.max(jnp.abs(out - ref)))
    assert err < 2e-3, err
    print("KERNEL_OK")
</pallas_src>

<mosaic_0001>
module attributes {stable_mosaic.version = 11 : i64} {
  func.func @_fused_head_classifier_kernel(%arg0: i32, %arg1: i32, %arg2: memref<1x256x128xbf16, #tpu.memory_space<vmem>>, %arg3: memref<128x256xbf16, #tpu.memory_space<vmem>>, %arg4: memref<128x1xf32, #tpu.memory_space<vmem>>, %arg5: memref<256x128xf32, #tpu.memory_space<vmem>>, %arg6: memref<256x1xf32, #tpu.memory_space<vmem>>, %arg7: memref<16x256xf32, #tpu.memory_space<vmem>>, %arg8: memref<16x1xf32, #tpu.memory_space<vmem>>, %arg9: memref<1x16x1xf32, #tpu.memory_space<vmem>>, %arg10: memref<128x1xf32, #tpu.memory_space<vmem>>) attributes {dimension_semantics = [#tpu.dimension_semantics<parallel>, #tpu.dimension_semantics<arbitrary>], iteration_bounds = array<i64: 2, 2>, scalar_prefetch = 0 : i64, scratch_operands = 1 : i64, tpu.core_type = #tpu.core_type<tc>, window_params = [{transform_indices = @transform_0, window_bounds = array<i64: 1, 256, 128>}, {pipeline_mode = #tpu.pipeline_mode<synchronous>, transform_indices = @transform_1, window_bounds = array<i64: 128, 256>}, {pipeline_mode = #tpu.pipeline_mode<synchronous>, transform_indices = @transform_2, window_bounds = array<i64: 128, 1>}, {pipeline_mode = #tpu.pipeline_mode<synchronous>, transform_indices = @transform_3, window_bounds = array<i64: 256, 128>}, {pipeline_mode = #tpu.pipeline_mode<synchronous>, transform_indices = @transform_4, window_bounds = array<i64: 256, 1>}, {pipeline_mode = #tpu.pipeline_mode<synchronous>, transform_indices = @transform_5, window_bounds = array<i64: 16, 256>}, {pipeline_mode = #tpu.pipeline_mode<synchronous>, transform_indices = @transform_6, window_bounds = array<i64: 16, 1>}, {transform_indices = @transform_7, window_bounds = array<i64: 1, 16, 1>}]} {
    %c0_i32 = arith.constant 0 : i32
    %0 = arith.cmpi eq, %arg1, %c0_i32 : i32
    %1 = arith.extui %0 : i1 to i32
    %c0_i32_0 = arith.constant 0 : i32
    %2 = arith.cmpi ne, %1, %c0_i32_0 : i32
    scf.if %2 {
      %cst_14 = arith.constant 0.000000e+00 : f32
      %20 = vector.broadcast %cst_14 : f32 to vector<128x1xf32>
      %c0_15 = arith.constant 0 : index
      %c0_16 = arith.constant 0 : index
      %21 = vector.load %arg10[%c0_15, %c0_16] : memref<128x1xf32, #tpu.memory_space<vmem>>, vector<128x1xf32>
      tpu.vector_store %arg10[%c0_15, %c0_16], %20 {strides = array<i32>} : memref<128x1xf32, #tpu.memory_space<vmem>>, vector<128x1xf32>,
    } else {
    }
    %c0 = arith.constant 0 : index
    %c0_1 = arith.constant 0 : index
    %3 = vector.load %arg3[%c0, %c0_1] : memref<128x256xbf16, #tpu.memory_space<vmem>>, vector<128x256xbf16>
    %c0_2 = arith.constant 0 : index
    %c0_3 = arith.constant 0 : index
    %c0_4 = arith.constant 0 : index
    %4 = vector.load %arg2[%c0_2, %c0_3, %c0_4] : memref<1x256x128xbf16, #tpu.memory_space<vmem>>, vector<1x256x128xbf16>
    %5 = vector.shape_cast %4 : vector<1x256x128xbf16> to vector<256x128xbf16>
    %cst = arith.constant dense<0.000000e+00> : vector<128x128xf32>
    %6 = tpu.matmul %3, %5, %cst {dimension_numbers = #tpu.dot_dimension_numbers<[1], [0], [0], [1], [0, 0, 1, 1], [], []>} : vector<128x256xbf16>, vector<256x128xbf16>, vector<128x128xf32> -> vector<128x128xf32>
    %c0_5 = arith.constant 0 : index
    %c0_6 = arith.constant 0 : index
    %7 = vector.load %arg4[%c0_5, %c0_6] : memref<128x1xf32, #tpu.memory_space<vmem>>, vector<128x1xf32>
    %8 = vector.broadcast %7 : vector<128x1xf32> to vector<128x128xf32>
    %9 = arith.addf %6, %8 : vector<128x128xf32>
    %cst_7 = arith.constant 0.000000e+00 : f32
    %10 = vector.broadcast %cst_7 : f32 to vector<128x128xf32>
    %11 = arith.maximumf %9, %10 : vector<128x128xf32>
    %c0_8 = arith.constant 0 : index
    %c0_9 = arith.constant 0 : index
    %12 = vector.load %arg10[%c0_8, %c0_9] : memref<128x1xf32, #tpu.memory_space<vmem>>, vector<128x1xf32>
    %cst_10 = arith.constant dense<0.000000e+00> : vector<128xf32>
    %13 = vector.multi_reduction <add>, %11, %cst_10 [1] : vector<128x128xf32> to vector<128xf32>
    %14 = vector.shape_cast %13 : vector<128xf32> to vector<128x1xf32>
    %15 = arith.addf %12, %14 : vector<128x1xf32>
    %c0_11 = arith.constant 0 : index
    %c0_12 = arith.constant 0 : index
    %16 = vector.load %arg10[%c0_11, %c0_12] : memref<128x1xf32, #tpu.memory_space<vmem>>, vector<128x1xf32>
    tpu.vector_store %arg10[%c0_11, %c0_12], %15 {strides = array<i32>} : memref<128x1xf32, #tpu.memory_space<vmem>>, vector<128x1xf32>,
    %c1_i32 = arith.constant 1 : i32
    %17 = arith.cmpi eq, %arg1, %c1_i32 : i32
    %18 = arith.extui %17 : i1 to i32
    %c0_i32_13 = arith.constant 0 : i32
    %19 = arith.cmpi ne, %18, %c0_i32_13 : i32
    scf.if %19 {
      %c0_14 = arith.constant 0 : index
      %c0_15 = arith.constant 0 : index
      %20 = vector.load %arg10[%c0_14, %c0_15] : memref<128x1xf32, #tpu.memory_space<vmem>>, vector<128x1xf32>
      %cst_16 = arith.constant 3.906250e-03 : f32
      %21 = vector.broadcast %cst_16 : f32 to vector<128x1xf32>
      %22 = arith.mulf %20, %21 : vector<128x1xf32>
      %c0_17 = arith.constant 0 : index
      %c0_18 = arith.constant 0 : index
      %23 = vector.load %arg5[%c0_17, %c0_18] : memref<256x128xf32, #tpu.memory_space<vmem>>, vector<256x128xf32>
      %cst_19 = arith.constant dense<0.000000e+00> : vector<256x1xf32>
      %24 = tpu.matmul %23, %22, %cst_19 {dimension_numbers = #tpu.dot_dimension_numbers<[1], [0], [0], [1], [0, 0, 1, 1], [], []>} : vector<256x128xf32>, vector<128x1xf32>, vector<256x1xf32> -> vector<256x1xf32>
      %c0_20 = arith.constant 0 : index
      %c0_21 = arith.constant 0 : index
      %25 = vector.load %arg6[%c0_20, %c0_21] : memref<256x1xf32, #tpu.memory_space<vmem>>, vector<256x1xf32>
      %26 = arith.addf %24, %25 : vector<256x1xf32>
      %cst_22 = arith.constant 0.000000e+00 : f32
      %27 = vector.broadcast %cst_22 : f32 to vector<256x1xf32>
      %28 = arith.maximumf %26, %27 : vector<256x1xf32>
      %c0_23 = arith.constant 0 : index
      %c0_24 = arith.constant 0 : index
      %29 = vector.load %arg7[%c0_23, %c0_24] : memref<16x256xf32, #tpu.memory_space<vmem>>, vector<16x256xf32>
      %cst_25 = arith.constant dense<0.000000e+00> : vector<16x1xf32>
      %30 = tpu.matmul %29, %28, %cst_25 {dimension_numbers = #tpu.dot_dimension_numbers<[1], [0], [0], [1], [0, 0, 1, 1], [], []>} : vector<16x256xf32>, vector<256x1xf32>, vector<16x1xf32> -> vector<16x1xf32>
      %c0_26 = arith.constant 0 : index
      %c0_27 = arith.constant 0 : index
      %31 = vector.load %arg8[%c0_26, %c0_27] : memref<16x1xf32, #tpu.memory_space<vmem>>, vector<16x1xf32>
      %32 = arith.addf %30, %31 : vector<16x1xf32>
      %33 = arith.negf %32 : vector<16x1xf32>
      %34 = math.exp %33 : vector<16x1xf32>
      %cst_28 = arith.constant 1.000000e+00 : f32
      %35 = vector.broadcast %cst_28 : f32 to vector<16x1xf32>
      %36 = arith.addf %35, %34 : vector<16x1xf32>
      %37 = arith.divf %35, %36 : vector<16x1xf32>
      %c0_29 = arith.constant 0 : index
      %c0_30 = arith.constant 0 : index
      %c0_31 = arith.constant 0 : index
      %38 = vector.load %arg9[%c0_29, %c0_30, %c0_31] : memref<1x16x1xf32, #tpu.memory_space<vmem>>, vector<1x16x1xf32>
      %39 = vector.shape_cast %38 : vector<1x16x1xf32> to vector<16x1xf32>
      %40 = vector.shape_cast %37 : vector<16x1xf32> to vector<1x16x1xf32>
      tpu.vector_store %arg9[%c0_29, %c0_30, %c0_31], %40 {strides = array<i32>} : memref<1x16x1xf32, #tpu.memory_space<vmem>>, vector<1x16x1xf32>,
    } else {
    }
    return
  }
  func.func @transform_0(%arg0: i32, %arg1: i32) -> (i32, i32, i32) {
    %c0_i32 = arith.constant 0 : i32
    %c0_i32_0 = arith.constant 0 : i32
    return %arg0, %c0_i32, %arg1 : i32, i32, i32
  }
  func.func @transform_1(%arg0: i32, %arg1: i32) -> (i32, i32) {
    %c0_i32 = arith.constant 0 : i32
    %c0_i32_0 = arith.constant 0 : i32
    %c0_i32_1 = arith.constant 0 : i32
    return %c0_i32, %c0_i32_0 : i32, i32
  }
  func.func @transform_2(%arg0: i32, %arg1: i32) -> (i32, i32) {
    %c0_i32 = arith.constant 0 : i32
    %c0_i32_0 = arith.constant 0 : i32
    %c0_i32_1 = arith.constant 0 : i32
    return %c0_i32, %c0_i32_0 : i32, i32
  }
  func.func @transform_3(%arg0: i32, %arg1: i32) -> (i32, i32) {
    %c0_i32 = arith.constant 0 : i32
    %c0_i32_0 = arith.constant 0 : i32
    %c0_i32_1 = arith.constant 0 : i32
    return %c0_i32, %c0_i32_0 : i32, i32
  }
  func.func @transform_4(%arg0: i32, %arg1: i32) -> (i32, i32) {
    %c0_i32 = arith.constant 0 : i32
    %c0_i32_0 = arith.constant 0 : i32
    %c0_i32_1 = arith.constant 0 : i32
    return %c0_i32, %c0_i32_0 : i32, i32
  }
  func.func @transform_5(%arg0: i32, %arg1: i32) -> (i32, i32) {
    %c0_i32 = arith.constant 0 : i32
    %c0_i32_0 = arith.constant 0 : i32
    %c0_i32_1 = arith.constant 0 : i32
    return %c0_i32, %c0_i32_0 : i32, i32
  }
  func.func @transform_6(%arg0: i32, %arg1: i32) -> (i32, i32) {
    %c0_i32 = arith.constant 0 : i32
    %c0_i32_0 = arith.constant 0 : i32
    %c0_i32_1 = arith.constant 0 : i32
    return %c0_i32, %c0_i32_0 : i32, i32
  }
  func.func @transform_7(%arg0: i32, %arg1: i32) -> (i32, i32, i32) {
    %c0_i32 = arith.constant 0 : i32
    %c0_i32_0 = arith.constant 0 : i32
    %c0_i32_1 = arith.constant 0 : i32
    return %arg0, %c0_i32, %c0_i32_0 : i32, i32, i32
  }
}

</mosaic_0001>

<bundles_post_ra>
// kernel: tpu_custom_call.1
= control target key start
LH: loop header
LB: loop body
LE: loop exit
PB: predicated region body
PF: predicated region fallthrough
CT: control target
= control target key end

     0   :  { %s3051_s0 = inlined_call_operand.hbm [shape: bf16[2,256,256], index: 0, kind: input, shape index: {}]   ;;  %s3052_s1 = inlined_call_operand.hbm [shape: bf16[128,256], index: 1, kind: input, shape index: {}]   ;;  %s3053_s2 = inlined_call_operand.hbm [shape: f32[128,1], index: 2, kind: input, shape index: {}]   ;;  %s3054_s3 = inlined_call_operand.hbm [shape: f32[256,128], index: 3, kind: input, shape index: {}]   ;;  %s3055_s4 = inlined_call_operand.hbm [shape: f32[256,1], index: 4, kind: input, shape index: {}]   ;;  %s3056_s5 = inlined_call_operand.hbm [shape: f32[16,256], index: 5, kind: input, shape index: {}]   ;;  %s3057_s6 = inlined_call_operand.hbm [shape: f32[16,1], index: 6, kind: input, shape index: {}]   ;;  %s3058_s7 = inlined_call_operand.hbm [shape: f32[2,16,1], index: 7, kind: output, shape index: {}]  }
   0x1   :  { %3071 = sst [smem:[#allocation26_spill]] %s3051_s0 }
   0x2   :  { %3072 = sst [smem:[#allocation27_spill]] %s3052_s1 }
   0x3   :  { %3073 = sst [smem:[#allocation28_spill]] %s3053_s2 }
   0x4   :  { %3074 = sst [smem:[#allocation29_spill]] %s3054_s3 }
   0x5   :  { %3075 = sst [smem:[#allocation30_spill]] %s3055_s4 }
   0x6   :  { %3076 = sst [smem:[#allocation31_spill]] %s3056_s5 }
   0x7   :  { %3077 = sst [smem:[#allocation32_spill]] %s3057_s6 }
   0x8   :  { %3078 = sst [smem:[#allocation33_spill]] %s3058_s7 }
   0x9   :  { %12 = vsyncpa [#allocation4], 0 }
   0xa   :  { %14 = vsyncpa [#allocation4 + $0x1], 0 }
   0xb   :  { %15 = vsyncpa [#allocation7], 0 }
   0xc   :  { %16 = vsyncpa [#allocation10], 0 }
   0xd   :  { %17 = vsyncpa [#allocation13], 0 }
   0xe   :  { %18 = vsyncpa [#allocation5], 0 }
   0xf   :  { %20 = vsyncpa [#allocation5 + $0x1], 0  ;;  %s2533_s24 = smov 0   ;;  %s2535_s25 = smov 0  }
  0x10   :  { %s2537_s26 = smov 0   ;;  %s2539_s27 = smov 0  }
  0x11   :  { %s2541_s28 = smov 0   ;;  %s2543_s29 = smov 0  }
  0x12   :  { %s2545_s30 = smov 0   ;;  %s2547_s8 = smov 0  }
  0x13   :  { %s2549_s9 = smov 0   ;;  %s2551_s10 = smov 0  }
  0x14   :  { %s2553_s11 = smov 0  }
  0x15 LB: > { %3079 = sst [smem:[#allocation21_spill]] %s2433_s24  ;;  %s1544_s12 = sadd.s32 4294967295, %s2473_s11   ;;  %s2473_s11 = sphi %s2553_s11, %s26_s11   ;;  %s2469_s10 = sphi %s2551_s10, %s3128_s10   ;;  %s2465_s9 = sphi %s2549_s9, %s3127_s9   ;;  %s2461_s8 = sphi %s2547_s8, %s3126_s8   ;;  %s2457_s30 = sphi %s2545_s30, %s3125_s30   ;;  %s2453_s29 = sphi %s2543_s29, %s3124_s29   ;;  %s2449_s28 = sphi %s2541_s28, %s3123_s28   ;;  %s2445_s27 = sphi %s2539_s27, %s3122_s27   ;;  %s2441_s26 = sphi %s2537_s26, %s3121_s26   ;;  %s2437_s25 = sphi %s2535_s25, %s3120_s25   ;;  %s2433_s24 = sphi %s2533_s24, %s3119_s24  }
  0x16   : > { %3080 = sst [smem:[#allocation22_spill]] %s2457_s30  ;;  %p1546_p0 = scmp.ge.s32.totalorder %s2473_s11, 1 }
  0x17   : > { %3081 = sst [smem:[#allocation23_spill]] %s2461_s8  ;;  %p2590_p1 = scmp.eq.s32.totalorder %s1544_s12, 0 }
  0x18   : > { %p2594_p2 = scmp.eq.s32.totalorder %s1544_s12, 3  ;;  %p223_p3 = scmp.lt.s32.totalorder %s2473_s11, 5 }
  0x19   : > { %s3082_s13 = scalar_select %p2590_p1, 1, 0 }
  0x1a   : > { %s3083_s14 = scalar_select %p2594_p2, 1, 0 }
  0x1b   : > { %p2599_p4 = pnand %p1546_p0, %p223_p3  ;;  %s2475_s16 = smov [#allocation6]  }
  0x1c   : > { %3084 = sst [smem:[#allocation24_spill]] %s3083_s14  ;;  %s235_s17 = sshll.u32 %s2475_s16, 4  ;;  %s2603_s17 = int_to_ptr.vmem [resolvable:$true] %s235_s17 }
  0x1d   : > { %s3085_s15 = scalar_select %p2599_p4, 1, 0 }
  0x1e   : > { %p1946_p5 = pneg %p2599_p4  ;;  %s2476_s19 = smov [#allocation9]  }
  0x1f   : > { %3086 = sst [smem:[#allocation25_spill]] %s3085_s15  ;;  %s261_s20 = sshll.u32 %s2476_s19, 4  ;;  %s2613_s20 = int_to_ptr.vmem [resolvable:$true] %s261_s20 }
  0x20   : > { %p2609_p6 = pnand %p1946_p5, %p2590_p1  ;;  %s2477_s21 = smov [#allocation12]  }
  0x21   : > { %s287_s22 = sshll.u32 %s2477_s21, 4  ;;  %s3088_s1 = sld [smem:[#allocation27_spill]]  ;;  %s2615_s22 = int_to_ptr.vmem [resolvable:$true] %s287_s22 }
  0x22   : > { %p2625_p8 = pneg %p2609_p6 }
  0x27   : > { %s2141_s16 = scalar_lea.hbm %s3088_s1, 2048 }
  0x28   : > { %p2142_p7 = scmp.ne.s32.totalorder %s3088_s1, %s2141_s16  ;;  %p2148_p11 = scmp.lt.u32.totalorder %s2141_s16, %s3088_s1 }
  0x2a   : > { %p2144_p9 = pnand %p2625_p8, %p2142_p7 }
  0x2c   : > { %p2145_p10 = pneg %p2144_p9 }
  0x2e   : > { %p2150_p12 = pnand %p2148_p11, %p2145_p10 }
  0x30   : > { %2153 = shalt.err (!%p2150_p12)
}
  0x31   : > { %s2154_s7 = scalar_lea.vmem %s2603_s17, 2048  ;;  %p2162_p5 = scmp.lt.s32.totalorder %s2603_s17, %s2603_s17 }
  0x32   : > { %p2155_p13 = scmp.ne.s32.totalorder %s2603_s17, %s2154_s7  ;;  %p2163_p4 = scmp.lt.s32.totalorder %s2154_s7, %s2154_s7 }
  0x34   : > { %p2157_p0 = pnand %p2155_p13, %p2625_p8  ;;  %p2164_p7 = por %p2163_p4, %p2162_p5 }
  0x36   : > { %p2158_p3 = pneg %p2157_p0 }
  0x38   : > { %p2165_p9 = pnand %p2164_p7, %p2158_p3 }
  0x3a   : > { %2168 = shalt.err (!%p2165_p9)
}
  0x3b   : > { %s3064_s8 = smov 128   ;;  %s3066_s23 = smov 8  }
  0x3c   : > { %1949 = dma.hbm_to_vmem [thread:$0]  (!%p2609_p6), %s3088_s1, 2048, %s2603_s17, [#allocation7], %s3064_s8, %s3064_s8, %s3066_s23  }
  0x3d   : > { %s3090_s3 = sld [smem:[#allocation29_spill]] }
  0x43   : > { %s2169_s7 = scalar_lea.hbm %s3090_s3, 4096 }
  0x44   : > { %p2170_p4 = scmp.ne.s32.totalorder %s3090_s3, %s2169_s7  ;;  %p2176_p12 = scmp.lt.u32.totalorder %s2169_s7, %s3090_s3 }
  0x46   : > { %p2172_p10 = pnand %p2170_p4, %p2625_p8 }
  0x48   : > { %p2173_p11 = pneg %p2172_p10 }
  0x4a   : > { %p2178_p13 = pnand %p2176_p12, %p2173_p11 }
  0x4c   : > { %2181 = shalt.err (!%p2178_p13)
}
  0x4d   : > { %s2182_s17 = scalar_lea.vmem %s2613_s20, 4096  ;;  %p2190_p7 = scmp.lt.s32.totalorder %s2613_s20, %s2613_s20 }
  0x4e   : > { %p2183_p0 = scmp.ne.s32.totalorder %s2613_s20, %s2182_s17  ;;  %p2191_p9 = scmp.lt.s32.totalorder %s2182_s17, %s2182_s17 }
  0x50   : > { %p2185_p3 = pnand %p2183_p0, %p2625_p8  ;;  %p2192_p4 = por %p2191_p9, %p2190_p7 }
  0x52   : > { %p2186_p5 = pneg %p2185_p3 }
  0x54   : > { %p2193_p10 = pnand %p2192_p4, %p2186_p5 }
  0x56   : > { %2196 = shalt.err (!%p2193_p10)
}
  0x57   : > { %1955 = dma.hbm_to_vmem [thread:$0]  (!%p2609_p6), %s3090_s3, 4096, %s2613_s20, [#allocation10], %s3064_s8, %s3064_s8, %s3066_s23  }
  0x58   : > { %s3091_s5 = sld [smem:[#allocation31_spill]] }
  0x5e   : > { %s2197_s12 = scalar_lea.hbm %s3091_s5, 512 }
  0x5f   : > { %p2198_p11 = scmp.ne.s32.totalorder %s3091_s5, %s2197_s12  ;;  %p2204_p0 = scmp.lt.u32.totalorder %s2197_s12, %s3091_s5 }
  0x61   : > { %p2200_p12 = pnand %p2198_p11, %p2625_p8 }
  0x63   : > { %p2201_p13 = pneg %p2200_p12 }
  0x65   : > { %p2206_p3 = pnand %p2204_p0, %p2201_p13 }
  0x67   : > { %2209 = shalt.err (!%p2206_p3)
}
  0x68   : > { %s2210_s20 = scalar_lea.vmem %s2615_s22, 512  ;;  %p2218_p4 = scmp.lt.s32.totalorder %s2615_s22, %s2615_s22 }
  0x69   : > { %p2211_p5 = scmp.ne.s32.totalorder %s2615_s22, %s2210_s20  ;;  %p2219_p10 = scmp.lt.s32.totalorder %s2210_s20, %s2210_s20 }
  0x6b   : > { %p2213_p7 = pnand %p2211_p5, %p2625_p8  ;;  %p2220_p11 = por %p2219_p10, %p2218_p4 }
  0x6d   : > { %p2214_p9 = pneg %p2213_p7 }
  0x6f   : > { %p2221_p12 = pnand %p2220_p11, %p2214_p9 }
  0x71   : > { %2224 = shalt.err (!%p2221_p12)
}
  0x72   : > { %s2480_s17 = smov 256   ;;  %s2481_s0 = smov 16  }
  0x73   : > { %1961 = dma.hbm_to_vmem [thread:$0]  (!%p2609_p6), %s3091_s5, 512, %s2615_s22, [#allocation13], %s2480_s17, %s2480_s17, %s2481_s0  }
  0x74   : > { %s2482_s15 = smov [#allocation8]   ;;  %s2483_s16 = smov [#allocation11]  }
  0x75   : > { %s248_s12 = sshll.u32 %s2482_s15, 4  ;;  %s274_s19 = sshll.u32 %s2483_s16, 4  ;;  %s249_s12 = int_to_ptr.vmem [resolvable:$true] %s248_s12  ;;  %s2698_s19 = int_to_ptr.vmem [resolvable:$true] %s274_s19 }
  0x76   : > { %s3092_s2 = sld [smem:[#allocation28_spill]] }
  0x7c   : > { %s2225_s20 = scalar_lea.hbm %s3092_s2, 2048 }
  0x7d   : > { %p2226_p13 = scmp.ne.s32.totalorder %s3092_s2, %s2225_s20  ;;  %p2232_p5 = scmp.lt.u32.totalorder %s2225_s20, %s3092_s2 }
  0x7f   : > { %p2228_p0 = pnand %p2226_p13, %p2625_p8 }
  0x81   : > { %p2229_p3 = pneg %p2228_p0 }
  0x83   : > { %p2234_p7 = pnand %p2232_p5, %p2229_p3 }
  0x85   : > { %2237 = shalt.err (!%p2234_p7)
}
  0x86   : > { %s2238_s17 = scalar_lea.vmem %s249_s12, 2048  ;;  %p2246_p11 = scmp.lt.s32.totalorder %s249_s12, %s249_s12 }
  0x87   : > { %p2239_p9 = scmp.ne.s32.totalorder %s249_s12, %s2238_s17  ;;  %p2247_p12 = scmp.lt.s32.totalorder %s2238_s17, %s2238_s17 }
  0x89   : > { %p2241_p4 = pnand %p2239_p9, %p2625_p8  ;;  %p2248_p2 = por %p2247_p12, %p2246_p11 }
  0x8b   : > { %p2242_p10 = pneg %p2241_p4 }
  0x8d   : > { %p2249_p1 = pnand %p2248_p2, %p2242_p10 }
  0x8f   : > { %2252 = shalt.err (!%p2249_p1)
}
  0x90   : > { %s3093_s8 = smov 8   ;;  %s3094_s23 = smov 128  }
  0x91   : > { %1952 = dma.hbm_to_vmem [thread:$0]  (!%p2609_p6), %s3092_s2, 2048, %s249_s12, [#allocation7], %s3094_s23, %s3094_s23, %s3093_s8  }
  0x92   : > { %s3095_s4 = sld [smem:[#allocation30_spill]] }
  0x98   : > { %s2253_s21 = scalar_lea.hbm %s3095_s4, 4096 }
  0x99   : > { %p2254_p13 = scmp.ne.s32.totalorder %s3095_s4, %s2253_s21  ;;  %p2260_p0 = scmp.lt.u32.totalorder %s2253_s21, %s3095_s4 }
  0x9b   : > { %p2256_p1 = pnand %p2254_p13, %p2625_p8 }
  0x9d   : > { %p2257_p2 = pneg %p2256_p1 }
  0x9f   : > { %p2262_p3 = pnand %p2260_p0, %p2257_p2 }
  0xa1   : > { %2265 = shalt.err (!%p2262_p3)
}
  0xa2   : > { %s2266_s12 = scalar_lea.vmem %s2698_s19, 4096  ;;  %p2274_p4 = scmp.lt.s32.totalorder %s2698_s19, %s2698_s19 }
  0xa3   : > { %p2267_p5 = scmp.ne.s32.totalorder %s2698_s19, %s2266_s12  ;;  %p2275_p10 = scmp.lt.s32.totalorder %s2266_s12, %s2266_s12 }
  0xa5   : > { %p2269_p7 = pnand %p2267_p5, %p2625_p8  ;;  %p2276_p11 = por %p2275_p10, %p2274_p4 }
  0xa7   : > { %p2270_p9 = pneg %p2269_p7 }
  0xa9   : > { %p2277_p12 = pnand %p2276_p11, %p2270_p9 }
  0xab   : > { %2280 = shalt.err (!%p2277_p12)
}
  0xac   : > { %1958 = dma.hbm_to_vmem [thread:$0]  (!%p2609_p6), %s3095_s4, 4096, %s2698_s19, [#allocation10], %s3094_s23, %s3094_s23, %s3093_s8  }
  0xad   : > { %s2484_s14 = smov [#allocation14]   ;;  %s3096_s6 = sld [smem:[#allocation32_spill]] }
  0xae   : > { %s300_s15 = sshll.u32 %s2484_s14, 4  ;;  %s301_s15 = int_to_ptr.vmem [resolvable:$true] %s300_s15 }
  0xb3   : > { %s2281_s7 = scalar_lea.hbm %s3096_s6, 256 }
  0xb4   : > { %p2282_p13 = scmp.ne.s32.totalorder %s3096_s6, %s2281_s7  ;;  %p2288_p0 = scmp.lt.u32.totalorder %s2281_s7, %s3096_s6 }
  0xb6   : > { %p2284_p1 = pnand %p2282_p13, %p2625_p8 }
  0xb8   : > { %p2285_p2 = pneg %p2284_p1 }
  0xba   : > { %p2290_p3 = pnand %p2288_p0, %p2285_p2 }
  0xbc   : > { %2293 = shalt.err (!%p2290_p3)
}
  0xbd   : > { %s2294_s19 = scalar_lea.vmem %s301_s15, 256  ;;  %p2302_p4 = scmp.lt.s32.totalorder %s301_s15, %s301_s15 }
  0xbe   : > { %p2295_p5 = scmp.ne.s32.totalorder %s301_s15, %s2294_s19  ;;  %p2303_p10 = scmp.lt.s32.totalorder %s2294_s19, %s2294_s19 }
  0xc0   : > { %p2297_p7 = pnand %p2295_p5, %p2625_p8  ;;  %p2304_p11 = por %p2303_p10, %p2302_p4 }
  0xc2   : > { %p2298_p9 = pneg %p2297_p7 }
  0xc4   : > { %p2305_p12 = pnand %p2304_p11, %p2298_p9 }
  0xc6   : > { %2308 = shalt.err (!%p2305_p12)
}
  0xc7   : > { %1964 = dma.hbm_to_vmem [thread:$0]  (!%p2609_p6), %s3096_s6, 256, %s301_s15, [#allocation13], %s3094_s23, %s3094_s23, %s3093_s8  }
  0xc8   : > { %s1545_s30 = sadd.s32 4294967294, %s2473_s11   ;;  %s35_s18 = sadd.s32 1, %s2465_s9 }
  0xc9   : > { %s3097_s14 = sld [smem:[#allocation24_spill]]  ;;  %s38_s16 = sadd.s32 1, %s2469_s10 }
  0xca   : > { %p36_p8 = scmp.ge.s32.totalorder %s35_s18, 2  ;;  %s3098_s21 = sld [smem:[#allocation21_spill]] }
  0xcb   : > { %s47_s7 = sadd.s32 1, %s2453_s29  ;;  %p54_p13 = scmp.ne.s32.totalorder %s2453_s29, %s2449_s28 }
  0xcc   : > { %p55_p1 = scmp.eq.s32.totalorder %s2473_s11, 0  ;;  %s3130_s18 = smov (%p36_p8, %s35_s18), 0 }
  0xcd   : > { %s3132_s16 = smov (!%p36_p8, %s38_s16), %s2469_s10  ;;  %s43_s20 = ssub.s32 %s2465_s9, %s3130_s18 }
  0xce   : > { %p2780_p6 = por %p55_p1, %p54_p13  ;;  %p40_p2 = scmp.ge.s32.totalorder %s3132_s16, 2 }
  0xcf   : > { %p60_p0 = scmp.ne.s32.totalorder %s2449_s28, %s2445_s27  ;;  %s199_s15 = sadd.s32 1, %s2441_s26 }
  0xd0   : > { %p209_p3 = scmp.ne.s32.totalorder %s2441_s26, %s2437_s25  ;;  %s3134_s16 = smov (%p40_p2, %s3132_s16), 0 }
  0xd1   : > { %p3100_p5 = scmp.ne.s32.totalorder %s3082_s13, 0  ;;  %p3102_p9 = scmp.ne.s32.totalorder %s3097_s14, 0 }
  0xd2   : > { %s42_s12 = ssub.s32 %s2469_s10, %s3134_s16  ;;  %p215_p10 = scmp.ne.s32.totalorder %s2437_s25, %s3098_s21 }
  0xd3   : > { %p2793_p7 = por %p3100_p5, %p60_p0  ;;  %p2799_p4 = por %p3102_p9, %p209_p3 }
  0xd4   : > { %s44_s27 = sor.u32 %s43_s20, %s42_s12  ;;  %p197_p11 = scmp.eq.s32.totalorder %s42_s12, 0 }
  0xd5   : > { %s3103_s22 = scalar_select %p2799_p4, 1, 0 }
  0xd6   : > { %p45_p12 = scmp.eq.s32.totalorder %s44_s27, 0  ;;  %p216_p8 = scmp.eq.s32.totalorder %s1545_s30, 3 }
  0xd7   : > { %s2808_s19 = scalar_select %p197_p11, %s2441_s26, %s199_s15  }
  0xd8   : > { %s2811_s17 = scalar_select %p45_p12, %s2453_s29, %s47_s7  }
  0xd9   : > { %p2813_p13 = por %p216_p8, %p215_p10  ;;  %p1979_p1 = scmp.lt.s32.totalorder %s2473_s11, 4 }
  0xda   : > { %s314_s14 = sand.u32 1, %s2453_s29   ;;  %s1555_s1 = sshll.u32 %s2469_s10, 6 }
  0xdb   : > { %s3104_s0 = scalar_select %p2813_p13, 1, 0 }
  0xdc   : > { %s1554_s2 = sshll.u32 %s314_s14, 7  ;;  %s323_s3 = sadd.s32 %s2465_s9, %s1555_s1 }
  0xdd   : > { %s1556_s4 = sshll.u32 %s323_s3, 6  ;;  %s318_s21 = scalar_lea.vmem [#allocation3], %s1554_s2 }
  0xde   : > { %s326_s20 = sshll.u32 %s318_s21, 4  ;;  %s3105_s27 = sld [smem:[#allocation26_spill]]  ;;  %s2826_s20 = int_to_ptr.vmem [resolvable:$true] %s326_s20 }
  0xdf   : > { %p2830_p2 = pnand %p1979_p1, %p2780_p6  ;;  %s2834_s1 = scalar_lea.sflag [#allocation4], %s314_s14 }
  0xe1   : > { %p2311_p3 = pneg %p2830_p2 }
  0xe4   : > { %s3106_s6 = smov %s3105_s27  ;;  %s2824_s30 = scalar_lea.hbm %s3105_s27, %s1556_s4 }
  0xe5   : > { %s2309_s2 = scalar_lea.hbm %s2824_s30, 2048  ;;  %s2314_s5 = scalar_lea.hbm %s3106_s6, 8192 }
  0xe6   : > { %p2310_p0 = scmp.ne.s32.totalorder %s2824_s30, %s2309_s2  ;;  %p2315_p6 = scmp.lt.u32.totalorder %s2824_s30, %s3106_s6 }
  0xe7   : > { %p2316_p10 = scmp.lt.u32.totalorder %s2314_s5, %s2309_s2  ;;  %p2318_p12 = scmp.lt.u32.totalorder %s2309_s2, %s2824_s30 }
  0xe8   : > { %p2312_p5 = pnand %p2311_p3, %p2310_p0 }
  0xe9   : > { %p2317_p11 = por %p2316_p10, %p2315_p6 }
  0xea   : > { %p2313_p9 = pneg %p2312_p5 }
  0xeb   : > { %p2319_p8 = por %p2318_p12, %p2317_p11 }
  0xed   : > { %p2320_p1 = pnand %p2319_p8, %p2313_p9 }
  0xef   : > { %2323 = shalt.err (!%p2320_p1)
}
  0xf0   : > { %s2324_s14 = scalar_lea.vmem %s2826_s20, 2048  ;;  %s2485_s21 = smov [#allocation3]  }
  0xf1   : > { %p2325_p0 = scmp.ne.s32.totalorder %s2826_s20, %s2324_s14  ;;  %s2329_s12 = sshll.u32 %s2485_s21, 4  ;;  %s2330_s12 = int_to_ptr.vmem [resolvable:$false] %s2329_s12 }
  0xf2   : > { %s2331_s27 = scalar_lea.vmem %s2330_s12, 4096  ;;  %p2332_p4 = scmp.lt.s32.totalorder %s2826_s20, %s2330_s12 }
  0xf3   : > { %p2327_p5 = pnand %p2325_p0, %p2311_p3  ;;  %p2333_p6 = scmp.lt.s32.totalorder %s2331_s27, %s2324_s14 }
  0xf5   : > { %p2328_p13 = pneg %p2327_p5  ;;  %p2334_p10 = por %p2333_p6, %p2332_p4 }
  0xf7   : > { %p2335_p11 = pnand %p2334_p10, %p2328_p13 }
  0xf9   : > { %2338 = shalt.err (!%p2335_p11)
}
  0xfa   : > { %s2486_s2 = smov 64   ;;  %s2487_s3 = smov 4  }
  0xfb   : > { %1968 = dma.hbm_to_vmem [thread:$0]  (!%p2830_p2), %s2824_s30, 2048, %s2826_s20, %s2834_s1, %s3094_s23, %s2486_s2, %s2487_s3  }
  0xfc   : > { %s3108_s4 = sld [smem:[#allocation25_spill]] }
 0x102   : > { %p3109_p3 = scmp.ne.s32.totalorder %s3108_s4, 0 }
 0x103   : > { %s340_s5 = sand.u32 (!%p3109_p3), 1, %s2449_s28  }
 0x104   : > { %338 = sbr.rel (%p3109_p3) target bundleno = 1308 (0x51c), region = 48  ;;  %s1558_s8 = sshll.u32 (!%p3109_p3), %s340_s5, 7 }
 0x105   : > { %s341_s15 = scalar_lea.sflag (!%p3109_p3), [#allocation4], %s340_s5  ;;  %s2866_s14 = scalar_lea.vmem (!%p3109_p3), [#allocation3], %s1558_s8 }
 0x10b   : > { %2412 = dma.done.wait (%p2793_p7), %s341_s15, 2048  }
 0x10c   : > { %2414 = vsyncadd (%p2793_p7), %s341_s15, 4294965248  ;;  %p3110_p4 = scmp.ne.s32.totalorder %s3082_s13, 0 }
 0x10e   : > { %2416 = dma.done.wait (%p3110_p4), [#allocation7], 4096  }
 0x10f   : > { %2418 = vsyncadd (%p3110_p4), [#allocation7], 4294963200 }
 0x110   : > { %2420 = dma.done.wait (%p3110_p4), [#allocation10], 8192  }
 0x111   : > { %2422 = vsyncadd (%p3110_p4), [#allocation10], 4294959104 }
 0x112   : > { %2424 = dma.done.wait (%p3110_p4), [#allocation13], 768  }
 0x113   : > { %2426 = vsyncadd (%p3110_p4), [#allocation13], 4294966528  ;;  %s396_s23 = sand.u32 1, %s2437_s25   ;;  %s3111_s30 = sld [smem:[#allocation22_spill]] }
 0x114   : > { %s1565_s24 = sshll.u32 %s396_s23, 4 }
 0x115   : > { %s2887_s20 = scalar_lea.vmem [#allocation15], %s1565_s24 }
 0x119   : > { %p1566_p7 = scmp.ne.s32.totalorder %s3111_s30, 0 }
 0x11a   : > { %vm404_vm0 = vcmask (!%p1566_p7), 7168   ;;  %v2488_v0 = vmov (!%p1566_p7), 0.0  }
 0x11b   : > { %403 = sbr.rel (%p1566_p7) target bundleno = 291 (0x123), region = 80  ;;  %405 = vst.msk [vmem:[#allocation2] sm:$0xff] (!%p1566_p7), %vm404_vm0, %v2488_v0  ;;  %406 = vst.msk [vmem:[#allocation2 + $0x8] sm:$0xff] (!%p1566_p7), %vm404_vm0, %v2488_v0 }
 0x11c   : > { %407 = vst.msk [vmem:[#allocation2 + $0x10] sm:$0xff] (!%p1566_p7), %vm404_vm0, %v2488_v0  ;;  %408 = vst.msk [vmem:[#allocation2 + $0x18] sm:$0xff] (!%p1566_p7), %vm404_vm0, %v2488_v0 }
 0x11d   : > { %409 = vst.msk [vmem:[#allocation2 + $0x20] sm:$0xff] (!%p1566_p7), %vm404_vm0, %v2488_v0  ;;  %410 = vst.msk [vmem:[#allocation2 + $0x28] sm:$0xff] (!%p1566_p7), %vm404_vm0, %v2488_v0 }
 0x11e   : > { %411 = vst.msk [vmem:[#allocation2 + $0x30] sm:$0xff] (!%p1566_p7), %vm404_vm0, %v2488_v0  ;;  %412 = vst.msk [vmem:[#allocation2 + $0x38] sm:$0xff] (!%p1566_p7), %vm404_vm0, %v2488_v0 }
 0x11f   : > { %413 = vst.msk [vmem:[#allocation2 + $0x40] sm:$0xff] (!%p1566_p7), %vm404_vm0, %v2488_v0  ;;  %414 = vst.msk [vmem:[#allocation2 + $0x48] sm:$0xff] (!%p1566_p7), %vm404_vm0, %v2488_v0 }
 0x120   : > { %415 = vst.msk [vmem:[#allocation2 + $0x50] sm:$0xff] (!%p1566_p7), %vm404_vm0, %v2488_v0  ;;  %416 = vst.msk [vmem:[#allocation2 + $0x58] sm:$0xff] (!%p1566_p7), %vm404_vm0, %v2488_v0 }
 0x121   : > { %417 = vst.msk [vmem:[#allocation2 + $0x60] sm:$0xff] (!%p1566_p7), %vm404_vm0, %v2488_v0  ;;  %418 = vst.msk [vmem:[#allocation2 + $0x68] sm:$0xff] (!%p1566_p7), %vm404_vm0, %v2488_v0 }
 0x122   : > { %419 = vst.msk [vmem:[#allocation2 + $0x70] sm:$0xff] %vm404_vm0, %v2488_v0  ;;  %420 = vst.msk [vmem:[#allocation2 + $0x78] sm:$0xff] %vm404_vm0, %v2488_v0 }
 0x123 PF: > { %v2093_v1 = vld [vmem:[%s2866_s14 + $0x40] sm:$0xff]   ;;  %v2489_v3 = vmov 0   ;;  %v2095_v4 = vld [vmem:[%s2866_s14 + $0x48] sm:$0xff]   ;;  %v2097_v6 = vld [vmem:[%s2866_s14 + $0x50] sm:$0xff]   ;;  %vm918_vm1 = vcmask 7168   ;;  %s3112_s13 = sld [smem:[#allocation22_spill]] }
 0x124   : > { %v2094_v2 = vld [vmem:[%s2866_s14] sm:$0xff]   ;;  %2092 = vset.pattern.permute.xlu1 %v2489_v3  ;;  %2091 = vset.pattern.permute.xlu0 %v2489_v3  ;;  %v2096_v5 = vld [vmem:[%s2866_s14 + $0x8] sm:$0xff]   ;;  %v2098_v7 = vld [vmem:[%s2866_s14 + $0x10] sm:$0xff]  }
 0x125   : > { %1608 = vmatprep.subr.bf16.mxu0 %v2093_v1  ;;  %1902 = vmatprep.subr.bf16.mxu1 %v2093_v1  ;;  %v2099_v8 = vld [vmem:[%s2866_s14 + $0x58] sm:$0xff]   ;;  %v2101_v10 = vld [vmem:[%s2866_s14 + $0x60] sm:$0xff]   ;;  %v2103_v12 = vld [vmem:[%s2866_s14 + $0x68] sm:$0xff]  }
 0x126   : > { %1609 = vmatpush3.bf16.msra.mxu0 %v2094_v2  ;;  %1910 = vmatpush3.bf16.msra.mxu1 %v2094_v2  ;;  %v2100_v9 = vld [vmem:[%s2866_s14 + $0x18] sm:$0xff]   ;;  %v2102_v11 = vld [vmem:[%s2866_s14 + $0x20] sm:$0xff]   ;;  %v2104_v15 = vld [vmem:[%s2866_s14 + $0x28] sm:$0xff]  }
 0x127   : > { %1610 = vmatprep.subr.bf16.mxu0 %v2095_v4  ;;  %1903 = vmatprep.subr.bf16.mxu1 %v2095_v4  ;;  %v2111_v13 = vld [vmem:[#allocation6 + $0x4] ss:$8 sps:$4 sm:$0xff]   ;;  %v2105_v16 = vld [vmem:[%s2866_s14 + $0x70] sm:$0xff]   ;;  %v2107_v18 = vld [vmem:[%s2866_s14 + $0x78] sm:$0xff]  }
 0x128   : > { %v2114_v14 = vld [vmem:[#allocation6 + $0x44] ss:$8 sps:$4 sm:$0xff]   ;;  %773 = vmatprep.mubr.bf16.mxu0 %v2111_v13  ;;  %v2106_v17 = vld [vmem:[%s2866_s14 + $0x30] sm:$0xff]   ;;  %v2108_v20 = vld [vmem:[%s2866_s14 + $0x38] sm:$0xff]  }
 0x129   : > { %805 = vmatprep.mubr.bf16.mxu1 %v2114_v14  ;;  %v471_v19 = vld [vmem:[#allocation8 + $0x10] sm:$0xff]  ;;  %v469_v21 = vld [vmem:[#allocation8] sm:$0xff]  ;;  %v472_v24 = vld [vmem:[#allocation8 + $0x18] sm:$0xff]  ;;  %p1599_p13 = scmp.ne.s32.totalorder %s3112_s13, 1 }
 0x12a   : > { %1611 = vmatpush3.bf16.msra.mxu0 %v2096_v5  ;;  %1911 = vmatpush3.bf16.msra.mxu1 %v2096_v5  ;;  %v2109_v22 = vld [vmem:[#allocation6] ss:$8 sps:$4 sm:$0xff]   ;;  %v2115_v26 = vld [vmem:[#allocation6 + $0x14] ss:$8 sps:$4 sm:$0xff]   ;;  %v2119_v30 = vld [vmem:[#allocation6 + $0x10] ss:$8 sps:$4 sm:$0xff]  }
 0x12b   : > { %1612 = vmatprep.subr.bf16.mxu0 %v2097_v6  ;;  %1904 = vmatprep.subr.bf16.mxu1 %v2097_v6  ;;  %v2112_v23 = vld [vmem:[#allocation6 + $0x40] ss:$8 sps:$4 sm:$0xff]   ;;  %v2117_v27 = vld [vmem:[#allocation6 + $0x54] ss:$8 sps:$4 sm:$0xff]   ;;  %v2120_v31 = vld [vmem:[#allocation6 + $0x50] ss:$8 sps:$4 sm:$0xff]  }
 0x12c   : > { %497 = vperm.xlu1 %2092, %v471_v19   ;;  %487 = vperm.xlu0 %2091, %v469_v21   ;;  %v470_v25 = vld [vmem:[#allocation8 + $0x8] sm:$0xff]  ;;  %v473_v29 = vld [vmem:[#allocation8 + $0x20] sm:$0xff]  ;;  %v476_v32 = vld [vmem:[#allocation8 + $0x38] sm:$0xff] }
 0x12d   : > { %v474_v28 = vld [vmem:[#allocation8 + $0x28] sm:$0xff]  ;;  %v475_v33 = vld [vmem:[#allocation8 + $0x30] sm:$0xff]  ;;  %v477_v37 = vld [vmem:[#allocation8 + $0x40] sm:$0xff] }
 0x12e   : > { %1613 = vmatpush3.bf16.msra.mxu0 %v2098_v7  ;;  %1912 = vmatpush3.bf16.msra.mxu1 %v2098_v7  ;;  %v2121_v34 = vld [vmem:[#allocation6 + $0x24] ss:$8 sps:$4 sm:$0xff]   ;;  %v2125_v38 = vld [vmem:[#allocation6 + $0x20] ss:$8 sps:$4 sm:$0xff]   ;;  %v480_v40 = vld [vmem:[#allocation8 + $0x58] sm:$0xff] }
 0x12f   : > { %1614 = vmatprep.subr.bf16.mxu0 %v2099_v8  ;;  %1905 = vmatprep.subr.bf16.mxu1 %v2099_v8  ;;  %v2123_v35 = vld [vmem:[#allocation6 + $0x64] ss:$8 sps:$4 sm:$0xff]   ;;  %v2126_v39 = vld [vmem:[#allocation6 + $0x60] ss:$8 sps:$4 sm:$0xff]   ;;  %v479_v41 = vld [vmem:[#allocation8 + $0x50] sm:$0xff] }
 0x130   : > { %502 = vperm.xlu1 %2092, %v472_v24   ;;  %492 = vperm.xlu0 %2091, %v470_v25   ;;  %v478_v36 = vld [vmem:[#allocation8 + $0x48] sm:$0xff]  ;;  %v2127_v42 = vld [vmem:[#allocation6 + $0x34] ss:$8 sps:$4 sm:$0xff]   ;;  %v481_v45 = vld [vmem:[#allocation8 + $0x60] sm:$0xff] }
 0x131   : > { %v2129_v43 = vld [vmem:[#allocation6 + $0x74] ss:$8 sps:$4 sm:$0xff]   ;;  %v482_v44 = vld [vmem:[#allocation8 + $0x68] sm:$0xff]  ;;  %v2131_v46 = vld [vmem:[#allocation6 + $0x30] ss:$8 sps:$4 sm:$0xff]  }
 0x132   : > { %1615 = vmatpush3.bf16.msra.mxu0 %v2100_v9  ;;  %1913 = vmatpush3.bf16.msra.mxu1 %v2100_v9  ;;  %v2132_v47 = vld [vmem:[#allocation6 + $0x70] ss:$8 sps:$4 sm:$0xff]  }
 0x133   : > { %1616 = vmatprep.subr.bf16.mxu0 %v2101_v10  ;;  %1906 = vmatprep.subr.bf16.mxu1 %v2101_v10  ;;  %v484_v48 = vld [vmem:[#allocation8 + $0x78] sm:$0xff]  ;;  %v483_v49 = vld [vmem:[#allocation8 + $0x70] sm:$0xff] }
 0x134   : > { %512 = vperm.xlu1 %2092, %v474_v28   ;;  %507 = vperm.xlu0 %2091, %v473_v29  }
 0x136   : > { %1617 = vmatpush3.bf16.msra.mxu0 %v2102_v11  ;;  %1914 = vmatpush3.bf16.msra.mxu1 %v2102_v11 }
 0x137   : > { %1618 = vmatprep.subr.bf16.mxu0 %v2103_v12  ;;  %1907 = vmatprep.subr.bf16.mxu1 %v2103_v12 }
 0x138   : > { %522 = vperm.xlu1 %2092, %v476_v32   ;;  %517 = vperm.xlu0 %2091, %v475_v33  }
 0x13a   : > { %1619 = vmatpush3.bf16.msra.mxu0 %v2104_v15  ;;  %1915 = vmatpush3.bf16.msra.mxu1 %v2104_v15 }
 0x13b   : > { %1620 = vmatprep.subr.bf16.mxu0 %v2105_v16  ;;  %1908 = vmatprep.subr.bf16.mxu1 %v2105_v16 }
 0x13c   : > { %532 = vperm.xlu1 %2092, %v478_v36   ;;  %527 = vperm.xlu0 %2091, %v477_v37  }
 0x13e   : > { %1621 = vmatpush3.bf16.msra.mxu0 %v2106_v17  ;;  %1916 = vmatpush3.bf16.msra.mxu1 %v2106_v17 }
 0x13f   : > { %1622 = vmatprep.subr.bf16.mxu0 %v2107_v18  ;;  %1909 = vmatprep.subr.bf16.mxu1 %v2107_v18 }
 0x140   : > { %542 = vperm.xlu1 %2092, %v480_v40   ;;  %537 = vperm.xlu0 %2091, %v479_v41  }
 0x142   : > { %1623 = vmatpush3.bf16.msra.mxu0 %v2108_v20  ;;  %1917 = vmatpush3.bf16.msra.mxu1 %v2108_v20 }
 0x144   : > { %552 = vperm.xlu1 %2092, %v482_v44   ;;  %547 = vperm.xlu0 %2091, %v481_v45  }
 0x145   : > { %774 = vmatmul.mubr.bf16.vlgmr.msra.gmra.mrb[0].mxu0 %v2109_v22  ;;  %806 = vmatmul.mubr.bf16.vlgmr.msra.gmra.mrb[0].mxu1 %v2112_v23 }
 0x146   : > { %781 = vmatprep.mubr.bf16.mxu0 %v2115_v26  ;;  %813 = vmatprep.mubr.bf16.mxu1 %v2117_v27 }
 0x148   : > { %562 = vperm.xlu1 %2092, %v484_v48   ;;  %557 = vperm.xlu0 %2091, %v483_v49  }
 0x14d   : > { %782 = vmatmul.mubr.bf16.gmra.mrb[4].mxu0 %v2119_v30  ;;  %814 = vmatmul.mubr.bf16.gmra.mrb[4].mxu1 %v2120_v31 }
 0x14e   : > { %789 = vmatprep.mubr.bf16.mxu0 %v2121_v34  ;;  %821 = vmatprep.mubr.bf16.mxu1 %v2123_v35 }
 0x155   : > { %790 = vmatmul.mubr.bf16.gmra.mrb[8].mxu0 %v2125_v38  ;;  %822 = vmatmul.mubr.bf16.gmra.mrb[8].mxu1 %v2126_v39 }
 0x156   : > { %797 = vmatprep.mubr.bf16.mxu0 %v2127_v42  ;;  %829 = vmatprep.mubr.bf16.mxu1 %v2129_v43 }
 0x15d   : > { %798 = vmatmul.mubr.bf16.gmra.mrb[12].mxu0 %v2131_v46  ;;  %830 = vmatmul.mubr.bf16.gmra.mrb[12].mxu1 %v2132_v47 }
 0x1ab   : > { %v488_v50 = vpop.permute.xlu0 %487  ;;  %v498_v51 = vpop.permute.xlu1 %497 }
 0x1af   : > { %v493_v52 = vpop.permute.xlu0 %492  ;;  %v503_v53 = vpop.permute.xlu1 %502 }
 0x1b3   : > { %v2922_v54 = vpop.permute.xlu0 %507  ;;  %v2924_v55 = vpop.permute.xlu1 %512 }
 0x1b7   : > { %v2926_v56 = vpop.permute.xlu0 %517  ;;  %v2928_v57 = vpop.permute.xlu1 %522 }
 0x1bb   : > { %v528_v58 = vpop.permute.xlu0 %527  ;;  %v533_v9 = vpop.permute.xlu1 %532 }
 0x1bf   : > { %v538_v14 = vpop.permute.xlu0 %537  ;;  %v543_v32 = vpop.permute.xlu1 %542 }
 0x218   : > { %v1624_v59 = vpop.f32.mrb[0].mxu0  ;;  %v1648_v60 = vpop.f32.mrb[0].mxu1 }
 0x219   : > { %v1625_v61 = vpop.f32.mrb[1].mxu0  ;;  %v1649_v62 = vpop.f32.mrb[1].mxu1 }
 0x21a   : > { %v1626_v63 = vadd.f32 %v1625_v61, %v1624_v59  ;;  %v1650_v0 = vadd.f32 %v1649_v62, %v1648_v60  ;;  %v1627_v1 = vpop.f32.mrb[2].mxu0  ;;  %v1651_v2 = vpop.f32.mrb[2].mxu1 }
 0x21b   : > { %v1628_v3 = vpop.f32.mrb[3].mxu0  ;;  %v1652_v4 = vpop.f32.mrb[3].mxu1 }
 0x21c   : > { %v1629_v5 = vadd.f32 %v1628_v3, %v1627_v1  ;;  %v1653_v6 = vadd.f32 %v1652_v4, %v1651_v2  ;;  %v808_v7 = vadd.f32 %v1650_v0, %v528_v58  ;;  %v776_v8 = vadd.f32 %v1626_v63, %v488_v50  ;;  %v548_v50 = vpop.permute.xlu0 %547 }
 0x21e   : > { %v846_v10 = vmax.f32 %v808_v7, 0.0  ;;  %v838_v11 = vmax.f32 %v776_v8, 0.0  ;;  %v779_v12 = vadd.f32 %v1629_v5, %v493_v52  ;;  %v811_v13 = vadd.f32 %v1653_v6, %v533_v9 }
 0x220   : > { %v1654_v15 = vpop.f32.mrb[4].mxu1  ;;  %886 = vadd.xlane.f32.xlu1 %v846_v10  ;;  %v1630_v16 = vpop.f32.mrb[4].mxu0  ;;  %870 = vadd.xlane.f32.xlu0 %v838_v11  ;;  %v839_v23 = vmax.f32 %v779_v12, 0.0  ;;  %v847_v24 = vmax.f32 %v811_v13, 0.0 }
 0x221   : > { %v1631_v17 = vpop.f32.mrb[5].mxu0  ;;  %v1655_v18 = vpop.f32.mrb[5].mxu1 }
 0x222   : > { %v1632_v19 = vadd.f32 %v1631_v17, %v1630_v16  ;;  %v1656_v20 = vadd.f32 %v1655_v18, %v1654_v15  ;;  %v1633_v21 = vpop.f32.mrb[6].mxu0  ;;  %v1657_v22 = vpop.f32.mrb[6].mxu1 }
 0x223   : > { %v1634_v25 = vpop.f32.mrb[7].mxu0  ;;  %v1658_v26 = vpop.f32.mrb[7].mxu1 }
 0x224   : > { %v1635_v27 = vadd.f32 %v1634_v25, %v1633_v21  ;;  %v1659_v28 = vadd.f32 %v1658_v26, %v1657_v22  ;;  %872 = vadd.xlane.f32.xlu1 %v839_v23  ;;  %888 = vadd.xlane.f32.xlu0 %v847_v24  ;;  %v816_v29 = vadd.f32 %v1656_v20, %v538_v14  ;;  %v558_v10 = vpop.permute.xlu0 %557  ;;  %v862_v20 = vld [vmem:[#allocation2 + $0x40] sm:$0xff]  ;;  %v855_v25 = vld [vmem:[#allocation2 + $0x8] sm:$0xff] }
 0x225   : > { %v784_v30 = vadd.f32 %v1632_v19, %v498_v51  ;;  %v854_v21 = vld [vmem:[#allocation2] sm:$0xff]  ;;  %v863_v26 = vld [vmem:[#allocation2 + $0x48] sm:$0xff] }
 0x226   : > { %v848_v31 = vmax.f32 %v816_v29, 0.0  ;;  %v787_v34 = vadd.f32 %v1635_v27, %v503_v53  ;;  %v819_v46 = vadd.f32 %v1659_v28, %v543_v32  ;;  %v553_v53 = vpop.permute.xlu1 %552 }
 0x227   : > { %v840_v33 = vmax.f32 %v784_v30, 0.0  ;;  %v864_v30 = vld [vmem:[#allocation2 + $0x50] sm:$0xff] }
 0x228   : > { %v1636_v35 = vpop.f32.mrb[8].mxu0  ;;  %v1660_v36 = vpop.f32.mrb[8].mxu1  ;;  %890 = vadd.xlane.f32.xlu1 %v848_v31  ;;  %v841_v45 = vmax.f32 %v787_v34, 0.0  ;;  %v849_v58 = vmax.f32 %v819_v46, 0.0  ;;  %v856_v31 = vld [vmem:[#allocation2 + $0x10] sm:$0xff]  ;;  %v859_v46 = vld [vmem:[#allocation2 + $0x28] sm:$0xff] }
 0x229   : > { %874 = vadd.xlane.f32.xlu0 %v840_v33  ;;  %v1637_v37 = vpop.f32.mrb[9].mxu0  ;;  %v1661_v38 = vpop.f32.mrb[9].mxu1 }
 0x22a   : > { %v1638_v39 = vadd.f32 %v1637_v37, %v1636_v35  ;;  %v1662_v40 = vadd.f32 %v1661_v38, %v1660_v36  ;;  %v1639_v41 = vpop.f32.mrb[10].mxu0  ;;  %v1663_v42 = vpop.f32.mrb[10].mxu1  ;;  %v857_v36 = vld [vmem:[#allocation2 + $0x18] sm:$0xff] }
 0x22b   : > { %v1640_v43 = vpop.f32.mrb[11].mxu0  ;;  %v1664_v44 = vpop.f32.mrb[11].mxu1 }
 0x22c   : > { %v1641_v47 = vadd.f32 %v1640_v43, %v1639_v41  ;;  %v1665_v48 = vadd.f32 %v1664_v44, %v1663_v42  ;;  %v792_v49 = vadd.f32 %v1638_v39, %v2922_v54  ;;  %v824_v52 = vadd.f32 %v1662_v40, %v548_v50  ;;  %v563_v15 = vpop.permute.xlu1 %562  ;;  %v858_v39 = vld [vmem:[#allocation2 + $0x20] sm:$0xff]  ;;  %v865_v40 = vld [vmem:[#allocation2 + $0x58] sm:$0xff] }
 0x22d   : > { %876 = vadd.xlane.f32.xlu0 %v841_v45  ;;  %v866_v45 = vld [vmem:[#allocation2 + $0x60] sm:$0xff] }
 0x22e   : > { %v842_v51 = vmax.f32 %v792_v49, 0.0  ;;  %v795_v59 = vadd.f32 %v1641_v47, %v2924_v55  ;;  %v850_v4 = vmax.f32 %v824_v52, 0.0  ;;  %v827_v7 = vadd.f32 %v1665_v48, %v553_v53  ;;  %v867_v52 = vld [vmem:[#allocation2 + $0x68] sm:$0xff] }
 0x230   : > { %v1642_v60 = vpop.f32.mrb[12].mxu0  ;;  %v1666_v61 = vpop.f32.mrb[12].mxu1  ;;  %878 = vadd.xlane.f32.xlu1 %v842_v51  ;;  %v843_v6 = vmax.f32 %v795_v59, 0.0  ;;  %v851_v13 = vmax.f32 %v827_v7, 0.0  ;;  %v860_v51 = vld [vmem:[#allocation2 + $0x30] sm:$0xff] }
 0x231   : > { %892 = vadd.xlane.f32.xlu0 %v849_v58  ;;  %v1643_v62 = vpop.f32.mrb[13].mxu0  ;;  %v1667_v63 = vpop.f32.mrb[13].mxu1 }
 0x232   : > { %v1644_v0 = vadd.f32 %v1643_v62, %v1642_v60  ;;  %v1668_v1 = vadd.f32 %v1667_v63, %v1666_v61  ;;  %v1645_v2 = vpop.f32.mrb[14].mxu0  ;;  %v1669_v3 = vpop.f32.mrb[14].mxu1  ;;  %v868_v61 = vld [vmem:[#allocation2 + $0x70] sm:$0xff]  ;;  %v861_v62 = vld [vmem:[#allocation2 + $0x38] sm:$0xff] }
 0x233   : > { %v1646_v54 = vpop.f32.mrb[15].mxu0  ;;  %v1670_v5 = vpop.f32.mrb[15].mxu1 }
 0x234   : > { %v1647_v8 = vadd.f32 %v1646_v54, %v1645_v2  ;;  %v1671_v9 = vadd.f32 %v1670_v5, %v1669_v3  ;;  %894 = vadd.xlane.f32.xlu1 %v850_v4  ;;  %v800_v55 = vadd.f32 %v1644_v0, %v2926_v56  ;;  %v832_v12 = vadd.f32 %v1668_v1, %v558_v10  ;;  %v869_v3 = vld [vmem:[#allocation2 + $0x78] sm:$0xff] }
 0x235   : > { %880 = vadd.xlane.f32.xlu0 %v843_v6 }
 0x236   : > { %v844_v11 = vmax.f32 %v800_v55, 0.0  ;;  %v803_v14 = vadd.f32 %v1647_v8, %v2928_v57  ;;  %v852_v16 = vmax.f32 %v832_v12, 0.0  ;;  %v835_v18 = vadd.f32 %v1671_v9, %v563_v15 }
 0x238   : > { %882 = vadd.xlane.f32.xlu1 %v844_v11  ;;  %v845_v17 = vmax.f32 %v803_v14, 0.0  ;;  %v853_v19 = vmax.f32 %v835_v18, 0.0 }
 0x239   : > { %896 = vadd.xlane.f32.xlu0 %v851_v13 }
 0x23c   : > { %898 = vadd.xlane.f32.xlu1 %v852_v16 }
 0x23d   : > { %884 = vadd.xlane.f32.xlu0 %v845_v17 }
 0x241   : > { %900 = vadd.xlane.f32.xlu0 %v853_v19 }
 0x2ad   : > { %v887_v56 = vpop.xlane.xlu1 %886  ;;  %v871_v22 = vpop.xlane.xlu0 %870 }
 0x2ae   : > { %v910_v23 = vadd.f32 %v887_v56, %v862_v20  ;;  %v902_v24 = vadd.f32 %v871_v22, %v854_v21  ;;  %v971_v20 = vld [vmem:[#allocation9] sm:$0xff] (!%p1599_p13) }
 0x2af   : > { %1790 = vmatprep.mubr.f32.mxu0 (!%p1599_p13), %v971_v20 }
 0x2b0   : > { %927 = vst.msk [vmem:[#allocation2 + $0x40] sm:$0xff] %vm918_vm1, %v910_v23  ;;  %919 = vst.msk [vmem:[#allocation2] sm:$0xff] %vm918_vm1, %v902_v24 }
 0x2b1   : > { %v873_v57 = vpop.xlane.xlu1 %872  ;;  %v889_v27 = vpop.xlane.xlu0 %888 }
 0x2b2   : > { %v903_v28 = vadd.f32 %v873_v57, %v855_v25  ;;  %v911_v29 = vadd.f32 %v889_v27, %v863_v26 }
 0x2b4   : > { %920 = vst.msk [vmem:[#allocation2 + $0x8] sm:$0xff] %vm918_vm1, %v903_v28  ;;  %928 = vst.msk [vmem:[#allocation2 + $0x48] sm:$0xff] %vm918_vm1, %v911_v29 }
 0x2b5   : > { %v891_v32 = vpop.xlane.xlu1 %890 }
 0x2b6   : > { %v912_v33 = vadd.f32 %v891_v32, %v864_v30  ;;  %v875_v34 = vpop.xlane.xlu0 %874 }
 0x2b7   : > { %v904_v35 = vadd.f32 %v875_v34, %v856_v31  ;;  %v939_v5 = vld [vmem:[#allocation2] sm:$0xff] (!%p1599_p13) }
 0x2b8   : > { %929 = vst.msk [vmem:[#allocation2 + $0x50] sm:$0xff] %vm918_vm1, %v912_v33  ;;  %v955_v8 = vmul.f32 (!%p1599_p13), 0.00390625, %v939_v5  ;;  %v947_v23 = vld [vmem:[#allocation2 + $0x40] sm:$0xff] (!%p1599_p13) }
 0x2b9   : > { %921 = vst.msk [vmem:[#allocation2 + $0x10] sm:$0xff] %vm918_vm1, %v904_v35  ;;  %v963_v26 = vmul.f32 (!%p1599_p13), 0.00390625, %v947_v23  ;;  %v995_v5 = vld [vmem:[#allocation9 + $0xc0] sm:$0xff] (!%p1599_p13) }
 0x2ba   : > { %v877_v37 = vpop.xlane.xlu0 %876 }
 0x2bb   : > { %v905_v38 = vadd.f32 %v877_v37, %v857_v36  ;;  %v940_v6 = vld [vmem:[#allocation2 + $0x8] sm:$0xff] (!%p1599_p13) }
 0x2bc   : > { %v956_v9 = vmul.f32 (!%p1599_p13), 0.00390625, %v940_v6  ;;  %v948_v24 = vld [vmem:[#allocation2 + $0x48] sm:$0xff] (!%p1599_p13) }
 0x2bd   : > { %922 = vst.msk [vmem:[#allocation2 + $0x18] sm:$0xff] %vm918_vm1, %v905_v38  ;;  %v879_v41 = vpop.xlane.xlu1 %878  ;;  %v964_v57 = vmul.f32 (!%p1599_p13), 0.00390625, %v948_v24  ;;  %v996_v6 = vld [vmem:[#allocation9 + $0xc8] sm:$0xff] (!%p1599_p13) }
 0x2be   : > { %v906_v42 = vadd.f32 %v879_v41, %v858_v39  ;;  %v893_v43 = vpop.xlane.xlu0 %892  ;;  %v1838_v14 = vpack.c.bf16 (!%p1599_p13), %v956_v9, %v955_v8  ;;  %v998_v8 = vld [vmem:[#allocation9 + $0xd8] sm:$0xff] (!%p1599_p13)  ;;  %v999_v9 = vld [vmem:[#allocation9 + $0xe0] sm:$0xff] (!%p1599_p13) }
 0x2bf   : > { %v913_v44 = vadd.f32 %v893_v43, %v865_v40  ;;  %v949_v27 = vld [vmem:[#allocation2 + $0x50] sm:$0xff] (!%p1599_p13)  ;;  %v1854_v29 = vpack.c.bf16 (!%p1599_p13), %v964_v57, %v963_v26  ;;  %v972_v43 = vld [vmem:[#allocation9 + $0x8] sm:$0xff] (!%p1599_p13) }
 0x2c0   : > { %923 = vst.msk [vmem:[#allocation2 + $0x20] sm:$0xff] %vm918_vm1, %v906_v42  ;;  %v941_v7 = vld [vmem:[#allocation2 + $0x10] sm:$0xff] (!%p1599_p13)  ;;  %1839 = vmatprep.subr.bf16.mxu0 (!%p1599_p13), %v1838_v14  ;;  %v965_v30 = vmul.f32 (!%p1599_p13), 0.00390625, %v949_v27  ;;  %v1008_v26 = vld [vmem:[#allocation11 + $0x28] sm:$0xff] (!%p1599_p13) }
 0x2c1   : > { %930 = vst.msk [vmem:[#allocation2 + $0x58] sm:$0xff] %vm918_vm1, %v913_v44  ;;  %v895_v47 = vpop.xlane.xlu1 %894  ;;  %v957_v10 = vmul.f32 (!%p1599_p13), 0.00390625, %v941_v7  ;;  %1841 = vmatpush3.bf16.msra.mxu0 (!%p1599_p13), %v1838_v14  ;;  %v973_v44 = vld [vmem:[#allocation9 + $0x10] sm:$0xff] (!%p1599_p13)  ;;  %v1003_v14 = vld [vmem:[#allocation11] sm:$0xff] (!%p1599_p13) }
 0x2c2   : > { %v914_v48 = vadd.f32 %v895_v47, %v866_v45  ;;  %v881_v49 = vpop.xlane.xlu0 %880  ;;  %v974_v45 = vld [vmem:[#allocation9 + $0x18] sm:$0xff] (!%p1599_p13)  ;;  %v976_v47 = vld [vmem:[#allocation9 + $0x28] sm:$0xff] (!%p1599_p13)  ;;  %v997_v7 = vld [vmem:[#allocation9 + $0xd0] sm:$0xff] (!%p1599_p13) }
 0x2c3   : > { %v907_v50 = vadd.f32 %v881_v49, %v859_v46  ;;  %v975_v46 = vld [vmem:[#allocation9 + $0x20] sm:$0xff] (!%p1599_p13)  ;;  %v978_v49 = vld [vmem:[#allocation9 + $0x38] sm:$0xff] (!%p1599_p13) }
 0x2c4   : > { %931 = vst.msk [vmem:[#allocation2 + $0x60] sm:$0xff] %vm918_vm1, %v914_v48  ;;  %v942_v55 = vld [vmem:[#allocation2 + $0x18] sm:$0xff] (!%p1599_p13)  ;;  %v977_v48 = vld [vmem:[#allocation9 + $0x30] sm:$0xff] (!%p1599_p13) }
 0x2c5   : > { %924 = vst.msk [vmem:[#allocation2 + $0x28] sm:$0xff] %vm918_vm1, %v907_v50  ;;  %v883_v53 = vpop.xlane.xlu1 %882  ;;  %v958_v13 = vmul.f32 (!%p1599_p13), 0.00390625, %v942_v55  ;;  %v979_v50 = vld [vmem:[#allocation9 + $0x40] sm:$0xff] (!%p1599_p13)  ;;  %v1000_v55 = vld [vmem:[#allocation9 + $0xe8] sm:$0xff] (!%p1599_p13) }
 0x2c6   : > { %v908_v58 = vadd.f32 %v883_v53, %v860_v51  ;;  %v897_v59 = vpop.xlane.xlu0 %896  ;;  %v980_v51 = vld [vmem:[#allocation9 + $0x48] sm:$0xff] (!%p1599_p13)  ;;  %v982_v53 = vld [vmem:[#allocation9 + $0x58] sm:$0xff] (!%p1599_p13) }
 0x2c7   : > { %v915_v60 = vadd.f32 %v897_v59, %v867_v52  ;;  %v943_v11 = vld [vmem:[#allocation2 + $0x20] sm:$0xff] (!%p1599_p13)  ;;  %v1842_v17 = vpack.c.bf16 (!%p1599_p13), %v958_v13, %v957_v10  ;;  %v981_v52 = vld [vmem:[#allocation9 + $0x50] sm:$0xff] (!%p1599_p13)  ;;  %v984_v59 = vld [vmem:[#allocation9 + $0x68] sm:$0xff] (!%p1599_p13) }
 0x2c8   : > { %925 = vst.msk [vmem:[#allocation2 + $0x30] sm:$0xff] %vm918_vm1, %v908_v58  ;;  %v959_v15 = vmul.f32 (!%p1599_p13), 0.00390625, %v943_v11  ;;  %v950_v28 = vld [vmem:[#allocation2 + $0x58] sm:$0xff] (!%p1599_p13)  ;;  %v983_v58 = vld [vmem:[#allocation9 + $0x60] sm:$0xff] (!%p1599_p13)  ;;  %v1001_v10 = vld [vmem:[#allocation9 + $0xf0] sm:$0xff] (!%p1599_p13) }
 0x2c9   : > { %932 = vst.msk [vmem:[#allocation2 + $0x68] sm:$0xff] %vm918_vm1, %v915_v60  ;;  %v899_v63 = vpop.xlane.xlu1 %898  ;;  %1843 = vmatprep.subr.bf16.mxu0 (!%p1599_p13), %v1842_v17  ;;  %v966_v31 = vmul.f32 (!%p1599_p13), 0.00390625, %v950_v28  ;;  %v985_v60 = vld [vmem:[#allocation9 + $0x70] sm:$0xff] (!%p1599_p13)  ;;  %v1002_v11 = vld [vmem:[#allocation9 + $0xf8] sm:$0xff] (!%p1599_p13)  ;;  %v1004_v13 = vld [vmem:[#allocation11 + $0x8] sm:$0xff] (!%p1599_p13) }
 0x2ca   : > { %v916_v0 = vadd.f32 %v899_v63, %v868_v61  ;;  %v885_v1 = vpop.xlane.xlu0 %884  ;;  %1845 = vmatpush3.bf16.msra.mxu0 (!%p1599_p13), %v1842_v17  ;;  %v986_v61 = vld [vmem:[#allocation9 + $0x78] sm:$0xff] (!%p1599_p13)  ;;  %v988_v63 = vld [vmem:[#allocation9 + $0x88] sm:$0xff] (!%p1599_p13)  ;;  %v1007_v28 = vld [vmem:[#allocation11 + $0x20] sm:$0xff] (!%p1599_p13) }
 0x2cb   : > { %v909_v2 = vadd.f32 %v885_v1, %v861_v62  ;;  %938 = sbr.rel (%p1599_p13) target bundleno = 1280 (0x500), region = 84  ;;  %v951_v32 = vld [vmem:[#allocation2 + $0x60] sm:$0xff] (!%p1599_p13)  ;;  %v1858_v34 = vpack.c.bf16 (!%p1599_p13), %v966_v31, %v965_v30  ;;  %v990_v1 = vld [vmem:[#allocation9 + $0x98] sm:$0xff] (!%p1599_p13) }
 0x2cc   : > { %933 = vst.msk [vmem:[#allocation2 + $0x70] sm:$0xff] %vm918_vm1, %v916_v0  ;;  %v944_v12 = vld [vmem:[#allocation2 + $0x28] sm:$0xff] (!%p1599_p13)  ;;  %v967_v35 = vmul.f32 (!%p1599_p13), 0.00390625, %v951_v32  ;;  %v987_v62 = vld [vmem:[#allocation9 + $0x80] sm:$0xff] (!%p1599_p13)  ;;  %v989_v0 = vld [vmem:[#allocation9 + $0x90] sm:$0xff] (!%p1599_p13) }
 0x2cd   : > { %926 = vst.msk [vmem:[#allocation2 + $0x38] sm:$0xff] %vm918_vm1, %v909_v2  ;;  %v960_v16 = vmul.f32 (!%p1599_p13), 0.00390625, %v944_v12  ;;  %v991_v2 = vld [vmem:[#allocation9 + $0xa0] sm:$0xff] (!%p1599_p13)  ;;  %v1293_v12 = vld [vmem:[#allocation12 + $0x8] sm:$0xff] (!%p1599_p13) }
 0x2ce   : > { %v901_v4 = vpop.xlane.xlu0 %900  ;;  %1362 = vmatprep.mubr.f32.mxu1 (!%p1599_p13), %v1293_v12 }
 0x2cf   : > { %v917_v54 = vadd.f32 %v901_v4, %v869_v3  ;;  %v945_v18 = vld [vmem:[#allocation2 + $0x30] sm:$0xff] (!%p1599_p13)  ;;  %v1846_v21 = vpack.c.bf16 (!%p1599_p13), %v960_v16, %v959_v15  ;;  %v992_v3 = vld [vmem:[#allocation9 + $0xa8] sm:$0xff] (!%p1599_p13) }
 0x2d0   : > { %v961_v56 = vmul.f32 (!%p1599_p13), 0.00390625, %v945_v18  ;;  %v952_v33 = vld [vmem:[#allocation2 + $0x68] sm:$0xff] (!%p1599_p13)  ;;  %v993_v4 = vld [vmem:[#allocation9 + $0xb0] sm:$0xff] (!%p1599_p13) }
 0x2d1   : > { %934 = vst.msk [vmem:[#allocation2 + $0x78] sm:$0xff] %vm918_vm1, %v917_v54  ;;  %1847 = vmatprep.subr.bf16.mxu0 (!%p1599_p13), %v1846_v21  ;;  %v968_v36 = vmul.f32 (!%p1599_p13), 0.00390625, %v952_v33  ;;  %v994_v54 = vld [vmem:[#allocation9 + $0xb8] sm:$0xff] (!%p1599_p13) }
 0x2d2   : > { %1849 = vmatpush3.bf16.msra.mxu0 %v1846_v21  ;;  %v1005_v21 = vld [vmem:[#allocation11 + $0x10] sm:$0xff] }
 0x2d3   : > { %v953_v37 = vld [vmem:[#allocation2 + $0x70] sm:$0xff]  ;;  %v1862_v39 = vpack.c.bf16 %v968_v36, %v967_v35  ;;  %v1010_v35 = vld [vmem:[#allocation11 + $0x38] sm:$0xff] }
 0x2d4   : > { %v946_v19 = vld [vmem:[#allocation2 + $0x38] sm:$0xff]  ;;  %v969_v40 = vmul.f32 0.00390625, %v953_v37  ;;  %v1009_v37 = vld [vmem:[#allocation11 + $0x30] sm:$0xff] }
 0x2d5   : > { %v962_v22 = vmul.f32 0.00390625, %v946_v19  ;;  %v1006_v19 = vld [vmem:[#allocation11 + $0x18] sm:$0xff] }
 0x2d7   : > { %v1850_v25 = vpack.c.bf16 %v962_v22, %v961_v56 }
 0x2d8   : > { %v954_v38 = vld [vmem:[#allocation2 + $0x78] sm:$0xff] }
 0x2d9   : > { %1851 = vmatprep.subr.bf16.mxu0 %v1850_v25  ;;  %v970_v41 = vmul.f32 0.00390625, %v954_v38 }
 0x2da   : > { %1853 = vmatpush3.bf16.msra.mxu0 %v1850_v25 }
 0x2db   : > { %1855 = vmatprep.subr.bf16.mxu0 %v1854_v29  ;;  %v1866_v42 = vpack.c.bf16 %v970_v41, %v969_v40 }
 0x2de   : > { %1857 = vmatpush3.bf16.msra.mxu0 %v1854_v29 }
 0x2df   : > { %1859 = vmatprep.subr.bf16.mxu0 %v1858_v34 }
 0x2e2   : > { %1861 = vmatpush3.bf16.msra.mxu0 %v1858_v34 }
 0x2e3   : > { %1863 = vmatprep.subr.bf16.mxu0 %v1862_v39 }
 0x2e6   : > { %1865 = vmatpush3.bf16.msra.mxu0 %v1862_v39 }
 0x2e7   : > { %1867 = vmatprep.subr.bf16.mxu0 %v1866_v42 }
 0x2ea   : > { %1869 = vmatpush3.bf16.msra.mxu0 %v1866_v42 }
 0x2ed   : > { %1791 = vmatmul.mubr.f32.vlgmr.msra.gmra.mrb[0].mxu0 %v972_v43 }
 0x2ee   : > { %1793 = vmatprep.mubr.f32.mxu0 %v973_v44  ;;  %v1012_v44 = vld [vmem:[#allocation11 + $0x48] sm:$0xff] }
 0x2f1   : > { %1794 = vmatmul.mubr.f32.gmra.mrb[2].mxu0 %v974_v45 }
 0x2f2   : > { %1796 = vmatprep.mubr.f32.mxu0 %v975_v46  ;;  %v1011_v46 = vld [vmem:[#allocation11 + $0x40] sm:$0xff] }
 0x2f5   : > { %1797 = vmatmul.mubr.f32.gmra.mrb[4].mxu0 %v976_v47 }
 0x2f6   : > { %1799 = vmatprep.mubr.f32.mxu0 %v977_v48 }
 0x2f9   : > { %1800 = vmatmul.mubr.f32.gmra.mrb[6].mxu0 %v978_v49 }
 0x2fa   : > { %1802 = vmatprep.mubr.f32.mxu0 %v979_v50 }
 0x2fd   : > { %1803 = vmatmul.mubr.f32.gmra.mrb[8].mxu0 %v980_v51 }
 0x2fe   : > { %1805 = vmatprep.mubr.f32.mxu0 %v981_v52 }
 0x301   : > { %1806 = vmatmul.mubr.f32.gmra.mrb[10].mxu0 %v982_v53  ;;  %v1014_v53 = vld [vmem:[#allocation11 + $0x58] sm:$0xff] }
 0x302   : > { %1808 = vmatprep.mubr.f32.mxu0 %v983_v58 }
 0x305   : > { %1809 = vmatmul.mubr.f32.gmra.mrb[12].mxu0 %v984_v59  ;;  %v1013_v59 = vld [vmem:[#allocation11 + $0x50] sm:$0xff] }
 0x306   : > { %1811 = vmatprep.mubr.f32.mxu0 %v985_v60 }
 0x309   : > { %1812 = vmatmul.mubr.f32.gmra.mrb[14].mxu0 %v986_v61 }
 0x30a   : > { %1814 = vmatprep.mubr.f32.mxu0 %v987_v62 }
 0x30d   : > { %1815 = vmatmul.mubr.f32.gmra.mrb[16].mxu0 %v988_v63 }
 0x30e   : > { %1817 = vmatprep.mubr.f32.mxu0 %v989_v0 }
 0x311   : > { %1818 = vmatmul.mubr.f32.gmra.mrb[18].mxu0 %v990_v1 }
 0x312   : > { %1820 = vmatprep.mubr.f32.mxu0 %v991_v2  ;;  %v1016_v2 = vld [vmem:[#allocation11 + $0x68] sm:$0xff] }
 0x315   : > { %1821 = vmatmul.mubr.f32.gmra.mrb[20].mxu0 %v992_v3 }
 0x316   : > { %1823 = vmatprep.mubr.f32.mxu0 %v993_v4  ;;  %v1015_v4 = vld [vmem:[#allocation11 + $0x60] sm:$0xff] }
 0x319   : > { %1824 = vmatmul.mubr.f32.gmra.mrb[22].mxu0 %v994_v54 }
 0x31a   : > { %1826 = vmatprep.mubr.f32.mxu0 %v995_v5 }
 0x31d   : > { %1827 = vmatmul.mubr.f32.gmra.mrb[24].mxu0 %v996_v6 }
 0x31e   : > { %1829 = vmatprep.mubr.f32.mxu0 %v997_v7 }
 0x321   : > { %1830 = vmatmul.mubr.f32.gmra.mrb[26].mxu0 %v998_v8 }
 0x322   : > { %1832 = vmatprep.mubr.f32.mxu0 %v999_v9 }
 0x325   : > { %1833 = vmatmul.mubr.f32.gmra.mrb[28].mxu0 %v1000_v55  ;;  %v1018_v55 = vld [vmem:[#allocation11 + $0x78] sm:$0xff] }
 0x326   : > { %1835 = vmatprep.mubr.f32.mxu0 %v1001_v10 }
 0x329   : > { %1836 = vmatmul.mubr.f32.gmra.mrb[30].mxu0 %v1002_v11  ;;  %v1017_v11 = vld [vmem:[#allocation11 + $0x70] sm:$0xff] }
 0x3c0   : > { %v1792_v15 = vpop.f32.mrb[0].mxu0 }
 0x3c1   : > { %v1107_v16 = vadd.f32 %v1792_v15, %v1004_v13  ;;  %v1101_v17 = vpop.f32.mrb[1].mxu0 }
 0x3c2   : > { %v1102_v18 = vadd.f32 %v1101_v17, %v1003_v14 }
 0x3c3   : > { %v1261_v20 = vmax.f32 %v1107_v16, 0.0 }
 0x3c4   : > { %v1260_v56 = vmax.f32 %v1102_v18, 0.0  ;;  %v1795_v22 = vpop.f32.mrb[2].mxu0  ;;  %v1020_v18 = vld [vmem:[#allocation11 + $0x88] sm:$0xff] }
 0x3c5   : > { %v1117_v23 = vadd.f32 %v1795_v22, %v1006_v19  ;;  %v1111_v24 = vpop.f32.mrb[3].mxu0 }
 0x3c6   : > { %v1112_v25 = vadd.f32 %v1111_v24, %v1005_v21  ;;  %v2951_v57 = vpack.c.bf16 %v1261_v20, %v1260_v56  ;;  %v1019_v20 = vld [vmem:[#allocation11 + $0x80] sm:$0xff] }
 0x3c7   : > { %v1263_v27 = vmax.f32 %v1117_v23, 0.0 }
 0x3c8   : > { %v1262_v29 = vmax.f32 %v1112_v25, 0.0  ;;  %v1798_v30 = vpop.f32.mrb[4].mxu0 }
 0x3c9   : > { %v1127_v31 = vadd.f32 %v1798_v30, %v1008_v26  ;;  %v1121_v32 = vpop.f32.mrb[5].mxu0  ;;  %v1022_v26 = vld [vmem:[#allocation11 + $0x98] sm:$0xff] }
 0x3ca   : > { %v2953_v33 = vpack.c.bf16 %v1263_v27, %v1262_v29  ;;  %v1122_v34 = vadd.f32 %v1121_v32, %v1007_v28  ;;  %v1021_v28 = vld [vmem:[#allocation11 + $0x90] sm:$0xff] }
 0x3cb   : > { %v1265_v36 = vmax.f32 %v1127_v31, 0.0 }
 0x3cc   : > { %v1264_v38 = vmax.f32 %v1122_v34, 0.0  ;;  %v1801_v39 = vpop.f32.mrb[6].mxu0 }
 0x3cd   : > { %v1137_v40 = vadd.f32 %v1801_v39, %v1010_v35  ;;  %v1131_v41 = vpop.f32.mrb[7].mxu0  ;;  %v1024_v35 = vld [vmem:[#allocation11 + $0xa8] sm:$0xff] }
 0x3ce   : > { %v2955_v42 = vpack.c.bf16 %v1265_v36, %v1264_v38  ;;  %v1132_v43 = vadd.f32 %v1131_v41, %v1009_v37  ;;  %v1023_v38 = vld [vmem:[#allocation11 + $0xa0] sm:$0xff] }
 0x3cf   : > { %v1267_v45 = vmax.f32 %v1137_v40, 0.0 }
 0x3d0   : > { %v1266_v47 = vmax.f32 %v1132_v43, 0.0  ;;  %v1804_v48 = vpop.f32.mrb[8].mxu0 }
 0x3d1   : > { %v1147_v49 = vadd.f32 %v1804_v48, %v1012_v44  ;;  %v1141_v50 = vpop.f32.mrb[9].mxu0  ;;  %v1025_v48 = vld [vmem:[#allocation11 + $0xb0] sm:$0xff] }
 0x3d2   : > { %v2957_v51 = vpack.c.bf16 %v1267_v45, %v1266_v47  ;;  %v1142_v52 = vadd.f32 %v1141_v50, %v1011_v46  ;;  %v1026_v46 = vld [vmem:[#allocation11 + $0xb8] sm:$0xff] }
 0x3d3   : > { %v1269_v58 = vmax.f32 %v1147_v49, 0.0 }
 0x3d4   : > { %v1268_v60 = vmax.f32 %v1142_v52, 0.0  ;;  %v1807_v61 = vpop.f32.mrb[10].mxu0 }
 0x3d5   : > { %v1157_v62 = vadd.f32 %v1807_v61, %v1014_v53  ;;  %v1151_v63 = vpop.f32.mrb[11].mxu0 }
 0x3d6   : > { %v2959_v0 = vpack.c.bf16 %v1269_v58, %v1268_v60  ;;  %v1152_v1 = vadd.f32 %v1151_v63, %v1013_v59  ;;  %v1028_v60 = vld [vmem:[#allocation11 + $0xc8] sm:$0xff] }
 0x3d7   : > { %v1271_v3 = vmax.f32 %v1157_v62, 0.0  ;;  %v1027_v62 = vld [vmem:[#allocation11 + $0xc0] sm:$0xff] }
 0x3d8   : > { %v1270_v54 = vmax.f32 %v1152_v1, 0.0  ;;  %v1810_v5 = vpop.f32.mrb[12].mxu0 }
 0x3d9   : > { %v1167_v6 = vadd.f32 %v1810_v5, %v1016_v2  ;;  %v1161_v7 = vpop.f32.mrb[13].mxu0 }
 0x3da   : > { %v2961_v8 = vpack.c.bf16 %v1271_v3, %v1270_v54  ;;  %v1162_v9 = vadd.f32 %v1161_v7, %v1015_v4  ;;  %v1030_v54 = vld [vmem:[#allocation11 + $0xd8] sm:$0xff] }
 0x3db   : > { %v1273_v10 = vmax.f32 %v1167_v6, 0.0  ;;  %v1029_v6 = vld [vmem:[#allocation11 + $0xd0] sm:$0xff] }
 0x3dc   : > { %v1272_v12 = vmax.f32 %v1162_v9, 0.0  ;;  %v1813_v13 = vpop.f32.mrb[14].mxu0 }
 0x3dd   : > { %v1177_v14 = vadd.f32 %v1813_v13, %v1018_v55  ;;  %v1171_v15 = vpop.f32.mrb[15].mxu0 }
 0x3de   : > { %v2963_v16 = vpack.c.bf16 %v1273_v10, %v1272_v12  ;;  %v1172_v17 = vadd.f32 %v1171_v15, %v1017_v11  ;;  %v1032_v12 = vld [vmem:[#allocation11 + $0xe8] sm:$0xff] }
 0x3df   : > { %v1275_v19 = vmax.f32 %v1177_v14, 0.0  ;;  %v1031_v14 = vld [vmem:[#allocation11 + $0xe0] sm:$0xff] }
 0x3e0   : > { %v1274_v21 = vmax.f32 %v1172_v17, 0.0  ;;  %v1816_v56 = vpop.f32.mrb[16].mxu0 }
 0x3e1   : > { %v1187_v22 = vadd.f32 %v1816_v56, %v1020_v18  ;;  %v1181_v23 = vpop.f32.mrb[17].mxu0 }
 0x3e2   : > { %v2965_v24 = vpack.c.bf16 %v1275_v19, %v1274_v21  ;;  %v1182_v25 = vadd.f32 %v1181_v23, %v1019_v20  ;;  %v1034_v21 = vld [vmem:[#allocation11 + $0xf8] sm:$0xff] }
 0x3e3   : > { %v1277_v27 = vmax.f32 %v1187_v22, 0.0  ;;  %v1033_v22 = vld [vmem:[#allocation11 + $0xf0] sm:$0xff] }
 0x3e4   : > { %v1276_v29 = vmax.f32 %v1182_v25, 0.0  ;;  %v1819_v30 = vpop.f32.mrb[18].mxu0 }
 0x3e5   : > { %v1197_v31 = vadd.f32 %v1819_v30, %v1022_v26  ;;  %v1191_v32 = vpop.f32.mrb[19].mxu0 }
 0x3e6   : > { %v1192_v34 = vadd.f32 %v1191_v32, %v1021_v28  ;;  %v1870_v36 = vpack.c.bf16 %v1277_v27, %v1276_v29  ;;  %v1295_v32 = vld [vmem:[#allocation12 + $0x18] sm:$0xff] }
 0x3e7   : > { %v1279_v37 = vmax.f32 %v1197_v31, 0.0  ;;  %v1292_v31 = vld [vmem:[#allocation12] sm:$0xff] }
 0x3e8   : > { %v1278_v39 = vmax.f32 %v1192_v34, 0.0  ;;  %v1822_v40 = vpop.f32.mrb[20].mxu0  ;;  %1871 = vmatprep.subr.bf16.mxu1 %v1870_v36  ;;  %v1294_v34 = vld [vmem:[#allocation12 + $0x10] sm:$0xff]  ;;  %v1296_v36 = vld [vmem:[#allocation14] sm:$0xff] }
 0x3e9   : > { %v1207_v41 = vadd.f32 %v1822_v40, %v1024_v35  ;;  %v1201_v43 = vpop.f32.mrb[21].mxu0  ;;  %1873 = vmatpush3.bf16.msra.mxu1 %v2951_v57  ;;  %v1297_v40 = vld [vmem:[#allocation14 + $0x8] sm:$0xff] }
 0x3ea   : > { %v1874_v44 = vpack.c.bf16 %v1279_v37, %v1278_v39  ;;  %v1202_v45 = vadd.f32 %v1201_v43, %v1023_v38 }
 0x3eb   : > { %v1281_v47 = vmax.f32 %v1207_v41, 0.0 }
 0x3ec   : > { %v1280_v49 = vmax.f32 %v1202_v45, 0.0  ;;  %v1825_v50 = vpop.f32.mrb[22].mxu0  ;;  %1875 = vmatprep.subr.bf16.mxu1 %v1874_v44 }
 0x3ed   : > { %v1217_v52 = vadd.f32 %v1825_v50, %v1026_v46  ;;  %v1211_v53 = vpop.f32.mrb[23].mxu0  ;;  %1877 = vmatpush3.bf16.msra.mxu1 %v2953_v33 }
 0x3ee   : > { %v1878_v58 = vpack.c.bf16 %v1281_v47, %v1280_v49  ;;  %v1212_v59 = vadd.f32 %v1211_v53, %v1025_v48 }
 0x3ef   : > { %v1283_v61 = vmax.f32 %v1217_v52, 0.0 }
 0x3f0   : > { %v1282_v63 = vmax.f32 %v1212_v59, 0.0  ;;  %v1828_v1 = vpop.f32.mrb[24].mxu0  ;;  %1879 = vmatprep.subr.bf16.mxu1 %v1878_v58 }
 0x3f1   : > { %v1227_v57 = vadd.f32 %v1828_v1, %v1028_v60  ;;  %v1221_v2 = vpop.f32.mrb[25].mxu0  ;;  %1881 = vmatpush3.bf16.msra.mxu1 %v2955_v42 }
 0x3f2   : > { %v1882_v3 = vpack.c.bf16 %v1283_v61, %v1282_v63  ;;  %v1222_v4 = vadd.f32 %v1221_v2, %v1027_v62 }
 0x3f3   : > { %v1285_v5 = vmax.f32 %v1227_v57, 0.0 }
 0x3f4   : > { %v1284_v7 = vmax.f32 %v1222_v4, 0.0  ;;  %v1831_v9 = vpop.f32.mrb[26].mxu0  ;;  %1883 = vmatprep.subr.bf16.mxu1 %v1882_v3 }
 0x3f5   : > { %v1237_v33 = vadd.f32 %v1831_v9, %v1030_v54  ;;  %v1231_v55 = vpop.f32.mrb[27].mxu0  ;;  %1885 = vmatpush3.bf16.msra.mxu1 %v2957_v51 }
 0x3f6   : > { %v1886_v10 = vpack.c.bf16 %v1285_v5, %v1284_v7  ;;  %v1232_v11 = vadd.f32 %v1231_v55, %v1029_v6 }
 0x3f7   : > { %v1287_v13 = vmax.f32 %v1237_v33, 0.0 }
 0x3f8   : > { %v1286_v15 = vmax.f32 %v1232_v11, 0.0  ;;  %v1834_v17 = vpop.f32.mrb[28].mxu0  ;;  %1887 = vmatprep.subr.bf16.mxu1 %v1886_v10 }
 0x3f9   : > { %v1247_v42 = vadd.f32 %v1834_v17, %v1032_v12  ;;  %v1241_v18 = vpop.f32.mrb[29].mxu0  ;;  %1889 = vmatpush3.bf16.msra.mxu1 %v2959_v0 }
 0x3fa   : > { %v1890_v19 = vpack.c.bf16 %v1287_v13, %v1286_v15  ;;  %v1242_v20 = vadd.f32 %v1241_v18, %v1031_v14 }
 0x3fb   : > { %v1289_v56 = vmax.f32 %v1247_v42, 0.0 }
 0x3fc   : > { %v1288_v23 = vmax.f32 %v1242_v20, 0.0  ;;  %v1837_v25 = vpop.f32.mrb[30].mxu0  ;;  %1891 = vmatprep.subr.bf16.mxu1 %v1890_v19 }
 0x3fd   : > { %v1257_v51 = vadd.f32 %v1837_v25, %v1034_v21  ;;  %v1251_v26 = vpop.f32.mrb[31].mxu0  ;;  %1893 = vmatpush3.bf16.msra.mxu1 %v2961_v8 }
 0x3fe   : > { %v1894_v27 = vpack.c.bf16 %v1289_v56, %v1288_v23  ;;  %v1252_v28 = vadd.f32 %v1251_v26, %v1033_v22 }
 0x3ff   : > { %v1291_v29 = vmax.f32 %v1257_v51, 0.0 }
 0x400   : > { %v1290_v30 = vmax.f32 %v1252_v28, 0.0  ;;  %1895 = vmatprep.subr.bf16.mxu1 %v1894_v27 }
 0x401   : > { %1897 = vmatpush3.bf16.msra.mxu1 %v2963_v16 }
 0x402   : > { %v1898_v0 = vpack.c.bf16 %v1291_v29, %v1290_v30 }
 0x404   : > { %1899 = vmatprep.subr.bf16.mxu1 %v1898_v0 }
 0x405   : > { %1901 = vmatpush3.bf16.msra.mxu1 %v2965_v24 }
 0x408   : > { %1363 = vmatmul.mubr.f32.vlgmr.msra.gmra.mrb[0].mxu1 %v1292_v31 }
 0x409   : > { %1367 = vmatprep.mubr.f32.mxu1 %v1295_v32 }
 0x40c   : > { %1368 = vmatmul.mubr.f32.gmra.mrb[2].mxu1 %v1294_v34 }
 0x4db   : > { %v1752_v35 = vpop.f32.mrb[0].mxu1 }
 0x4dc   : > { %v1753_v8 = vpop.f32.mrb[1].mxu1 }
 0x4dd   : > { %v1754_v37 = vadd.f32 %v1753_v8, %v1752_v35 }
 0x4df   : > { %v1365_v38 = vadd.f32 %v1754_v37, %v1296_v36  ;;  %v1755_v39 = vpop.f32.mrb[2].mxu1 }
 0x4e0   : > { %v1756_v41 = vpop.f32.mrb[3].mxu1 }
 0x4e1   : > { %v1600_v16 = vmul.f32 -1.442695, %v1365_v38  ;;  %v1757_v43 = vadd.f32 %v1756_v41, %v1755_v39 }
 0x4e3   : > { %2133 = vpow2.f32 %v1600_v16  ;;  %v1370_v24 = vadd.f32 %v1757_v43, %v1297_v40 }
 0x4e5   : > { %v1601_v44 = vmul.f32 -1.442695, %v1370_v24 }
 0x4e7   : > { %2135 = vpow2.f32 %v1601_v44 }
 0x4ed   : > { %v2134_v45 = vpop.eup %2133 }
 0x4ee   : > { %v1379_v46 = vadd.f32 1.0, %v2134_v45 }
 0x4f0   : > { %2137 = vrcp.f32 %v1379_v46 }
 0x4f1   : > { %v2136_v47 = vpop.eup %2135 }
 0x4f2   : > { %v1380_v48 = vadd.f32 1.0, %v2136_v47 }
 0x4f4   : > { %2139 = vrcp.f32 %v1380_v48 }
 0x4fa   : > { %v2138_v49 = vpop.eup %2137 }
 0x4fb   : > { %1385 = vst.msk [vmem:[%s2887_s20] sm:$0xff] %vm918_vm1, %v2138_v49 }
 0x4fe   : > { %v2140_v50 = vpop.eup %2139 }
 0x4ff   : > { %1386 = vst.msk [vmem:[%s2887_s20 + $0x8] sm:$0xff] %vm918_vm1, %v2140_v50 }
 0x500 PF: > { %s3113_s7 = sld [smem:[#allocation23_spill]]  ;;  %s3114_s27 = sld [smem:[#allocation33_spill]] }
 0x501   : > { %s1401_s4 = sshll.u32 %s2887_s20, 4  ;;  %s2990_s5 = scalar_lea.sflag [#allocation5], %s396_s23  ;;  %s2986_s4 = int_to_ptr.vmem [resolvable:$true] %s1401_s4 }
 0x502   : > { %s2339_s8 = scalar_lea.vmem %s2986_s4, 256  ;;  %p3116_p9 = scmp.ne.s32.totalorder %s3103_s22, 0 }
 0x503   : > { %p2340_p2 = scmp.ne.s32.totalorder %s2986_s4, %s2339_s8  ;;  %s2490_s15 = smov [#allocation15]  }
 0x504   : > { %s2343_s14 = sshll.u32 %s2490_s15, 4  ;;  %s2344_s14 = int_to_ptr.vmem [resolvable:$false] %s2343_s14 }
 0x505   : > { %p2341_p12 = pnand %p2340_p2, %p3116_p9  ;;  %s2345_s24 = scalar_lea.vmem %s2344_s14, 512 }
 0x506   : > { %s1607_s1 = sshll.u32 %s3113_s7, 8  ;;  %s3115_s2 = smov %s3114_s27 }
 0x507   : > { %s2983_s3 = scalar_lea.hbm %s3114_s27, %s1607_s1  ;;  %p2342_p8 = pneg %p2341_p12 }
 0x508   : > { %p2346_p1 = scmp.lt.s32.totalorder %s2986_s4, %s2344_s14  ;;  %p2347_p0 = scmp.lt.s32.totalorder %s2345_s24, %s2339_s8 }
 0x50a   : > { %p2348_p5 = por %p2347_p0, %p2346_p1 }
 0x50c   : > { %p2349_p6 = pnand %p2348_p5, %p2342_p8 }
 0x50e   : > { %2352 = shalt.err (!%p2349_p6)
}
 0x50f   : > { %s2353_s23 = scalar_lea.hbm %s2983_s3, 256  ;;  %s2357_s13 = scalar_lea.hbm %s3115_s2, 512 }
 0x510   : > { %p2354_p10 = scmp.ne.s32.totalorder %s2983_s3, %s2353_s23  ;;  %p2358_p4 = scmp.lt.u32.totalorder %s2983_s3, %s3115_s2 }
 0x511   : > { %p2359_p7 = scmp.lt.u32.totalorder %s2357_s13, %s2353_s23  ;;  %p2361_p2 = scmp.lt.u32.totalorder %s2353_s23, %s2983_s3 }
 0x512   : > { %p2355_p11 = pnand %p2354_p10, %p3116_p9 }
 0x513   : > { %p2360_p13 = por %p2359_p7, %p2358_p4 }
 0x514   : > { %p2356_p3 = pneg %p2355_p11 }
 0x515   : > { %p2362_p12 = por %p2361_p2, %p2360_p13 }
 0x517   : > { %p2363_p8 = pnand %p2362_p12, %p2356_p3 }
 0x519   : > { %2366 = shalt.err (!%p2363_p8)
}
 0x51a   : > { %s2491_s21 = smov 128   ;;  %s2492_s12 = smov 8  }
 0x51b   : > { %1944 = dma.vmem_to_hbm [thread:$0]  (%p3116_p9), %s2986_s4, 256, %s2983_s3, %s2990_s5, %s2491_s21, %s2491_s21, %s2492_s12  }
 0x51c PF: > { %s3117_s27 = sld [smem:[#allocation21_spill]]  ;;  %p1986_p1 = scmp.ge.s32.totalorder %s2473_s11, 2 }
 0x51d   : > { %p3118_p0 = scmp.ne.s32.totalorder %s3104_s0, 0 }
 0x51f   : > { %p1970_p5 = pnand %p1986_p1, %p3118_p0 }
 0x522   : > { %s1416_s8 = sand.u32 1, %s3117_s27  }
 0x523   : > { %s1417_s15 = scalar_lea.sflag [#allocation5], %s1416_s8 }
 0x524   : > { %2428 = dma.done.wait (!%p1970_p5), %s1417_s15, 256  }
 0x525   : > { %2430 = vsyncadd (!%p1970_p5), %s1417_s15, 4294967040  ;;  %s26_s11 = sadd.s32 1, %s2473_s11   ;;  %s3119_s24 = smov %s2437_s25 }
 0x526   : > { %p23_p6 = scmp.ge.s32.totalorder %s26_s11, 6   ;;  %s3120_s25 = smov %s2441_s26 }
 0x527   : > { %s3121_s26 = smov %s2808_s19  ;;  %s3122_s27 = smov %s2449_s28 }
 0x528   : > { %s3123_s28 = smov %s2453_s29  ;;  %s3124_s29 = smov %s2811_s17 }
 0x529   : > { %s3125_s30 = smov %s2465_s9  ;;  %s3126_s8 = smov %s2469_s10 }
 0x52a   : > { %s3127_s9 = smov %s3130_s18  ;;  %s3128_s10 = smov %s3134_s16 }
 0x52b   :  { %25 = sbr.rel (!%p23_p6) target bundleno = 21 (0x15), region = 125 }
 0x532   :  { %1422 = vsyncpa [#allocation4], 1 }
 0x533   :  { %1424 = vsyncpa [#allocation4 + $0x1], 1 }
 0x534   :  { %1425 = vsyncpa [#allocation7], 1 }
 0x535   :  { %1426 = vsyncpa [#allocation10], 1 }
 0x536   :  { %1427 = vsyncpa [#allocation13], 1 }
 0x537   :  { %1428 = vsyncpa [#allocation5], 1 }
 0x538   :  { %1430 = vsyncpa [#allocation5 + $0x1], 1 }

</bundles_post_ra>
